<compile_context>
chip_gen: v7x
topology: tpu7x:2x2x1
jax: 0.10.0
libtpu: 0.0.40
codegen_flags: <defaults>
</compile_context>

<pallas_src>
import functools
import math

import jax
import jax.numpy as jnp
from jax.experimental import pallas as pl
from jax.experimental.pallas import tpu as pltpu

# ----------------------------- configuration ---------------------------------
B = 2            # batch
T = 8            # sequence length
D_MODEL = 128    # d_model (as used by the Sul-BertGRU model: gru_hidden_size)
N_HEADS = 4
D_K = D_MODEL // N_HEADS

F32 = jnp.float32
VMEM_SPEC = pl.BlockSpec(memory_space=pltpu.MemorySpace.VMEM)


# ============================== fused MHA kernel ==============================
def _mha_kernel(batch, seq, n_heads, d_k,
                xcat_ref, wqkv_ref, bqkv_ref, wo_ref, bo_ref, out_ref):
    """Fused multi-head attention.

    xcat_ref : (B*T, 3*H)  -- [query | key | value] concatenated along lanes
    wqkv_ref : (3*H, 3*H)  -- block-diagonal diag(Wq, Wk, Wv)
    bqkv_ref : (1, 3*H)    -- [bq | bk | bv]
    wo_ref   : (H, H)       bo_ref : (1, H)
    out_ref  : (B*T, H)
    """
    d_model = wo_ref.shape[0]

    # One fused Q/K/V projection (single MXU issue, K = 3*H); bias broadcast over sublanes.
    proj = (jnp.dot(xcat_ref[...], wqkv_ref[...], preferred_element_type=F32)
            + bqkv_ref[...])                                          # (B*T, 3H)
    q = proj[:, :d_model]                 # slices at 128-lane boundaries: free
    k = proj[:, d_model:2 * d_model]
    v = proj[:, 2 * d_model:]

    inv_sqrt_dk = 1.0 / math.sqrt(d_k)

    # TODO(synk): optional attention mask not implemented (model always passes mask=None).
    row_blocks = []
    for b in range(batch):                # static unroll: B * n_heads = 8 tiny tiles
        rows = slice(b * seq, (b + 1) * seq)
        head_outs = []
        for h in range(n_heads):
            cols = slice(h * d_k, (h + 1) * d_k)
            qh = q[rows, cols]            # (T, d_k)
            kh = k[rows, cols]
            vh = v[rows, cols]
            s = jnp.dot(qh, kh.T, preferred_element_type=F32) * inv_sqrt_dk   # (T, T)
            p_attn = jax.nn.softmax(s, axis=-1)     # dropout(p=0) == identity
            head_outs.append(jnp.dot(p_attn, vh, preferred_element_type=F32))
        row_blocks.append(jnp.concatenate(head_outs, axis=-1))                # (T, H)
    o = jnp.concatenate(row_blocks, axis=0)                                   # (B*T, H)

    # Output projection; single lane-dense (B*T, H) store.
    out_ref[...] = (jnp.dot(o, wo_ref[...], preferred_element_type=F32)
                    + bo_ref[...]).astype(out_ref.dtype)


def multihead_attention(params, query, key, value):
    """query/key/value: (B, T, d_model) -> (B, T, d_model). Matches nn.Module.forward(mask=None)."""
    b, t, d = query.shape
    n = b * t
    # Fold batch into rows; concat q|k|v along lanes so the kernel issues one projection matmul.
    xcat = jnp.concatenate(
        [query.reshape(n, d), key.reshape(n, d), value.reshape(n, d)], axis=1)  # (N, 3H)
    kernel = functools.partial(_mha_kernel, b, t, N_HEADS, d // N_HEADS)
    out = pl.pallas_call(
        kernel,
        out_shape=jax.ShapeDtypeStruct((n, d), F32),
        in_specs=[VMEM_SPEC] * 5,
        out_specs=VMEM_SPEC,
    )(xcat, params["w_qkv"], params["b_qkv"], params["wo"], params["bo"])
    return out.reshape(b, t, d)


# ========================== deterministic parameters ==========================
def _uniform(key, shape, bound):
    return jax.random.uniform(key, shape, F32, minval=-bound, maxval=bound)


def init_params(key, d_model=D_MODEL):
    # nn.Linear(d_model, d_model) init: U(-1/sqrt(d_model), 1/sqrt(d_model)).
    # Weights stored transposed (in, out) so projections are x @ W + b.
    bound = 1.0 / math.sqrt(d_model)
    ks = jax.random.split(key, 8)
    wq = _uniform(ks[0], (d_model, d_model), bound)
    wk = _uniform(ks[1], (d_model, d_model), bound)
    wv = _uniform(ks[2], (d_model, d_model), bound)
    wo = _uniform(ks[3], (d_model, d_model), bound)
    bq = _uniform(ks[4], (1, d_model), bound)
    bk = _uniform(ks[5], (1, d_model), bound)
    bv = _uniform(ks[6], (1, d_model), bound)
    bo = _uniform(ks[7], (1, d_model), bound)

    z = jnp.zeros((d_model, d_model), F32)
    w_qkv = jnp.concatenate([
        jnp.concatenate([wq, z, z], axis=1),
        jnp.concatenate([z, wk, z], axis=1),
        jnp.concatenate([z, z, wv], axis=1)], axis=0)          # (3H, 3H) block-diagonal
    b_qkv = jnp.concatenate([bq, bk, bv], axis=1)              # (1, 3H)

    return dict(w_qkv=w_qkv, b_qkv=b_qkv, wo=wo, bo=bo,
                wq=wq, wk=wk, wv=wv, bq=bq, bk=bk, bv=bv)


# ======================= pure-JAX reference (PyTorch math) ====================
def mha_reference(p, query, key, value, n_heads=N_HEADS):
    b, t, d = query.shape
    dk = d // n_heads
    q = query @ p["wq"] + p["bq"]
    k = key @ p["wk"] + p["bk"]
    v = value @ p["wv"] + p["bv"]

    def split(x):  # (B, T, H) -> (B, nh, T, dk)
        return x.reshape(b, t, n_heads, dk).transpose(0, 2, 1, 3)

    qh, kh, vh = split(q), split(k), split(v)
    s = jnp.einsum("bhqd,bhkd->bhqk", qh, kh) / math.sqrt(dk)
    a = jax.nn.softmax(s, axis=-1)
    o = jnp.einsum("bhqk,bhkd->bhqd", a, vh)
    o = o.transpose(0, 2, 1, 3).reshape(b, t, d)
    return o @ p["wo"] + p["bo"]


# =================================== main =====================================
if __name__ == "__main__":
    root = jax.random.PRNGKey(0)
    kp, kq, kk, kv = jax.random.split(root, 4)
    params = init_params(kp)

    query = jax.random.normal(kq, (B, T, D_MODEL), F32)
    key_in = jax.random.normal(kk, (B, T, D_MODEL), F32)
    value = jax.random.normal(kv, (B, T, D_MODEL), F32)

    fwd = jax.jit(multihead_attention)
    out = fwd(params, query, key_in, value)
    jax.block_until_ready(out)

    ref = mha_reference(params, query, key_in, value)
    assert out.shape == (B, T, D_MODEL)
    assert bool(jnp.all(jnp.isfinite(out)))
    assert bool(jnp.allclose(out, ref, atol=1e-3, rtol=1e-3))
    print("KERNEL_OK")
</pallas_src>

<mosaic_0001>
module attributes {stable_mosaic.version = 11 : i64} {
  func.func @_mha_kernel(%arg0: memref<16x384xf32, #tpu.memory_space<vmem>>, %arg1: memref<384x384xf32, #tpu.memory_space<vmem>>, %arg2: memref<1x384xf32, #tpu.memory_space<vmem>>, %arg3: memref<128x128xf32, #tpu.memory_space<vmem>>, %arg4: memref<1x128xf32, #tpu.memory_space<vmem>>, %arg5: memref<16x128xf32, #tpu.memory_space<vmem>>) attributes {dimension_semantics = [], scalar_prefetch = 0 : i64, scratch_operands = 0 : i64, tpu.core_type = #tpu.core_type<tc>} {
    %c0 = arith.constant 0 : index
    %c0_0 = arith.constant 0 : index
    %0 = vector.load %arg0[%c0, %c0_0] : memref<16x384xf32, #tpu.memory_space<vmem>>, vector<16x384xf32>
    %c0_1 = arith.constant 0 : index
    %c0_2 = arith.constant 0 : index
    %1 = vector.load %arg1[%c0_1, %c0_2] : memref<384x384xf32, #tpu.memory_space<vmem>>, vector<384x384xf32>
    %cst = arith.constant dense<0.000000e+00> : vector<16x384xf32>
    %2 = tpu.matmul %0, %1, %cst {dimension_numbers = #tpu.dot_dimension_numbers<[1], [0], [0], [1], [0, 0, 1, 1], [], []>} : vector<16x384xf32>, vector<384x384xf32>, vector<16x384xf32> -> vector<16x384xf32>
    %c0_3 = arith.constant 0 : index
    %c0_4 = arith.constant 0 : index
    %3 = vector.load %arg2[%c0_3, %c0_4] : memref<1x384xf32, #tpu.memory_space<vmem>>, vector<1x384xf32>
    %4 = vector.broadcast %3 : vector<1x384xf32> to vector<16x384xf32>
    %5 = arith.addf %2, %4 : vector<16x384xf32>
    %6 = vector.extract_strided_slice %5 {offsets = [0, 0], sizes = [16, 128], strides = [1, 1]} : vector<16x384xf32> to vector<16x128xf32>
    %7 = vector.extract_strided_slice %5 {offsets = [0, 128], sizes = [16, 128], strides = [1, 1]} : vector<16x384xf32> to vector<16x128xf32>
    %8 = vector.extract_strided_slice %5 {offsets = [0, 256], sizes = [16, 128], strides = [1, 1]} : vector<16x384xf32> to vector<16x128xf32>
    %9 = vector.extract_strided_slice %6 {offsets = [0, 0], sizes = [8, 32], strides = [1, 1]} : vector<16x128xf32> to vector<8x32xf32>
    %10 = vector.extract_strided_slice %7 {offsets = [0, 0], sizes = [8, 32], strides = [1, 1]} : vector<16x128xf32> to vector<8x32xf32>
    %11 = vector.extract_strided_slice %8 {offsets = [0, 0], sizes = [8, 32], strides = [1, 1]} : vector<16x128xf32> to vector<8x32xf32>
    %12 = tpu.transpose %10, [1, 0] : vector<8x32xf32> -> vector<32x8xf32>
    %cst_5 = arith.constant dense<0.000000e+00> : vector<8x8xf32>
    %13 = tpu.matmul %9, %12, %cst_5 {dimension_numbers = #tpu.dot_dimension_numbers<[1], [0], [0], [1], [0, 0, 1, 1], [], []>} : vector<8x32xf32>, vector<32x8xf32>, vector<8x8xf32> -> vector<8x8xf32>
    %cst_6 = arith.constant 0.176776692 : f32
    %14 = vector.broadcast %cst_6 : f32 to vector<8x8xf32>
    %15 = arith.mulf %13, %14 : vector<8x8xf32>
    %cst_7 = arith.constant dense<0xFF800000> : vector<8xf32>
    %16 = vector.multi_reduction <maximumf>, %15, %cst_7 [1] : vector<8x8xf32> to vector<8xf32>
    %cst_8 = arith.constant 0xFF800000 : f32
    %17 = vector.broadcast %cst_8 : f32 to vector<8xf32>
    %18 = arith.maximumf %17, %16 : vector<8xf32>
    %19 = vector.shape_cast %18 : vector<8xf32> to vector<8x1xf32>
    %20 = vector.broadcast %19 : vector<8x1xf32> to vector<8x8xf32>
    %21 = arith.subf %15, %20 : vector<8x8xf32>
    %22 = math.exp %21 : vector<8x8xf32>
    %cst_9 = arith.constant dense<0.000000e+00> : vector<8xf32>
    %23 = vector.multi_reduction <add>, %22, %cst_9 [1] : vector<8x8xf32> to vector<8xf32>
    %24 = vector.shape_cast %23 : vector<8xf32> to vector<8x1xf32>
    %25 = vector.broadcast %24 : vector<8x1xf32> to vector<8x8xf32>
    %26 = arith.divf %22, %25 : vector<8x8xf32>
    %cst_10 = arith.constant dense<0.000000e+00> : vector<8x32xf32>
    %27 = tpu.matmul %26, %11, %cst_10 {dimension_numbers = #tpu.dot_dimension_numbers<[1], [0], [0], [1], [0, 0, 1, 1], [], []>} : vector<8x8xf32>, vector<8x32xf32>, vector<8x32xf32> -> vector<8x32xf32>
    %28 = vector.extract_strided_slice %6 {offsets = [0, 32], sizes = [8, 32], strides = [1, 1]} : vector<16x128xf32> to vector<8x32xf32>
    %29 = vector.extract_strided_slice %7 {offsets = [0, 32], sizes = [8, 32], strides = [1, 1]} : vector<16x128xf32> to vector<8x32xf32>
    %30 = vector.extract_strided_slice %8 {offsets = [0, 32], sizes = [8, 32], strides = [1, 1]} : vector<16x128xf32> to vector<8x32xf32>
    %31 = tpu.transpose %29, [1, 0] : vector<8x32xf32> -> vector<32x8xf32>
    %cst_11 = arith.constant dense<0.000000e+00> : vector<8x8xf32>
    %32 = tpu.matmul %28, %31, %cst_11 {dimension_numbers = #tpu.dot_dimension_numbers<[1], [0], [0], [1], [0, 0, 1, 1], [], []>} : vector<8x32xf32>, vector<32x8xf32>, vector<8x8xf32> -> vector<8x8xf32>
    %cst_12 = arith.constant 0.176776692 : f32
    %33 = vector.broadcast %cst_12 : f32 to vector<8x8xf32>
    %34 = arith.mulf %32, %33 : vector<8x8xf32>
    %cst_13 = arith.constant dense<0xFF800000> : vector<8xf32>
    %35 = vector.multi_reduction <maximumf>, %34, %cst_13 [1] : vector<8x8xf32> to vector<8xf32>
    %cst_14 = arith.constant 0xFF800000 : f32
    %36 = vector.broadcast %cst_14 : f32 to vector<8xf32>
    %37 = arith.maximumf %36, %35 : vector<8xf32>
    %38 = vector.shape_cast %37 : vector<8xf32> to vector<8x1xf32>
    %39 = vector.broadcast %38 : vector<8x1xf32> to vector<8x8xf32>
    %40 = arith.subf %34, %39 : vector<8x8xf32>
    %41 = math.exp %40 : vector<8x8xf32>
    %cst_15 = arith.constant dense<0.000000e+00> : vector<8xf32>
    %42 = vector.multi_reduction <add>, %41, %cst_15 [1] : vector<8x8xf32> to vector<8xf32>
    %43 = vector.shape_cast %42 : vector<8xf32> to vector<8x1xf32>
    %44 = vector.broadcast %43 : vector<8x1xf32> to vector<8x8xf32>
    %45 = arith.divf %41, %44 : vector<8x8xf32>
    %cst_16 = arith.constant dense<0.000000e+00> : vector<8x32xf32>
    %46 = tpu.matmul %45, %30, %cst_16 {dimension_numbers = #tpu.dot_dimension_numbers<[1], [0], [0], [1], [0, 0, 1, 1], [], []>} : vector<8x8xf32>, vector<8x32xf32>, vector<8x32xf32> -> vector<8x32xf32>
    %47 = vector.extract_strided_slice %6 {offsets = [0, 64], sizes = [8, 32], strides = [1, 1]} : vector<16x128xf32> to vector<8x32xf32>
    %48 = vector.extract_strided_slice %7 {offsets = [0, 64], sizes = [8, 32], strides = [1, 1]} : vector<16x128xf32> to vector<8x32xf32>
    %49 = vector.extract_strided_slice %8 {offsets = [0, 64], sizes = [8, 32], strides = [1, 1]} : vector<16x128xf32> to vector<8x32xf32>
    %50 = tpu.transpose %48, [1, 0] : vector<8x32xf32> -> vector<32x8xf32>
    %cst_17 = arith.constant dense<0.000000e+00> : vector<8x8xf32>
    %51 = tpu.matmul %47, %50, %cst_17 {dimension_numbers = #tpu.dot_dimension_numbers<[1], [0], [0], [1], [0, 0, 1, 1], [], []>} : vector<8x32xf32>, vector<32x8xf32>, vector<8x8xf32> -> vector<8x8xf32>
    %cst_18 = arith.constant 0.176776692 : f32
    %52 = vector.broadcast %cst_18 : f32 to vector<8x8xf32>
    %53 = arith.mulf %51, %52 : vector<8x8xf32>
    %cst_19 = arith.constant dense<0xFF800000> : vector<8xf32>
    %54 = vector.multi_reduction <maximumf>, %53, %cst_19 [1] : vector<8x8xf32> to vector<8xf32>
    %cst_20 = arith.constant 0xFF800000 : f32
    %55 = vector.broadcast %cst_20 : f32 to vector<8xf32>
    %56 = arith.maximumf %55, %54 : vector<8xf32>
    %57 = vector.shape_cast %56 : vector<8xf32> to vector<8x1xf32>
    %58 = vector.broadcast %57 : vector<8x1xf32> to vector<8x8xf32>
    %59 = arith.subf %53, %58 : vector<8x8xf32>
    %60 = math.exp %59 : vector<8x8xf32>
    %cst_21 = arith.constant dense<0.000000e+00> : vector<8xf32>
    %61 = vector.multi_reduction <add>, %60, %cst_21 [1] : vector<8x8xf32> to vector<8xf32>
    %62 = vector.shape_cast %61 : vector<8xf32> to vector<8x1xf32>
    %63 = vector.broadcast %62 : vector<8x1xf32> to vector<8x8xf32>
    %64 = arith.divf %60, %63 : vector<8x8xf32>
    %cst_22 = arith.constant dense<0.000000e+00> : vector<8x32xf32>
    %65 = tpu.matmul %64, %49, %cst_22 {dimension_numbers = #tpu.dot_dimension_numbers<[1], [0], [0], [1], [0, 0, 1, 1], [], []>} : vector<8x8xf32>, vector<8x32xf32>, vector<8x32xf32> -> vector<8x32xf32>
    %66 = vector.extract_strided_slice %6 {offsets = [0, 96], sizes = [8, 32], strides = [1, 1]} : vector<16x128xf32> to vector<8x32xf32>
    %67 = vector.extract_strided_slice %7 {offsets = [0, 96], sizes = [8, 32], strides = [1, 1]} : vector<16x128xf32> to vector<8x32xf32>
    %68 = vector.extract_strided_slice %8 {offsets = [0, 96], sizes = [8, 32], strides = [1, 1]} : vector<16x128xf32> to vector<8x32xf32>
    %69 = tpu.transpose %67, [1, 0] : vector<8x32xf32> -> vector<32x8xf32>
    %cst_23 = arith.constant dense<0.000000e+00> : vector<8x8xf32>
    %70 = tpu.matmul %66, %69, %cst_23 {dimension_numbers = #tpu.dot_dimension_numbers<[1], [0], [0], [1], [0, 0, 1, 1], [], []>} : vector<8x32xf32>, vector<32x8xf32>, vector<8x8xf32> -> vector<8x8xf32>
    %cst_24 = arith.constant 0.176776692 : f32
    %71 = vector.broadcast %cst_24 : f32 to vector<8x8xf32>
    %72 = arith.mulf %70, %71 : vector<8x8xf32>
    %cst_25 = arith.constant dense<0xFF800000> : vector<8xf32>
    %73 = vector.multi_reduction <maximumf>, %72, %cst_25 [1] : vector<8x8xf32> to vector<8xf32>
    %cst_26 = arith.constant 0xFF800000 : f32
    %74 = vector.broadcast %cst_26 : f32 to vector<8xf32>
    %75 = arith.maximumf %74, %73 : vector<8xf32>
    %76 = vector.shape_cast %75 : vector<8xf32> to vector<8x1xf32>
    %77 = vector.broadcast %76 : vector<8x1xf32> to vector<8x8xf32>
    %78 = arith.subf %72, %77 : vector<8x8xf32>
    %79 = math.exp %78 : vector<8x8xf32>
    %cst_27 = arith.constant dense<0.000000e+00> : vector<8xf32>
    %80 = vector.multi_reduction <add>, %79, %cst_27 [1] : vector<8x8xf32> to vector<8xf32>
    %81 = vector.shape_cast %80 : vector<8xf32> to vector<8x1xf32>
    %82 = vector.broadcast %81 : vector<8x1xf32> to vector<8x8xf32>
    %83 = arith.divf %79, %82 : vector<8x8xf32>
    %cst_28 = arith.constant dense<0.000000e+00> : vector<8x32xf32>
    %84 = tpu.matmul %83, %68, %cst_28 {dimension_numbers = #tpu.dot_dimension_numbers<[1], [0], [0], [1], [0, 0, 1, 1], [], []>} : vector<8x8xf32>, vector<8x32xf32>, vector<8x32xf32> -> vector<8x32xf32>
    %85 = tpu.concatenate %27, %46, %65, %84 in 1 : vector<8x32xf32>, vector<8x32xf32>, vector<8x32xf32>, vector<8x32xf32> -> vector<8x128xf32>
    %86 = vector.extract_strided_slice %6 {offsets = [8, 0], sizes = [8, 32], strides = [1, 1]} : vector<16x128xf32> to vector<8x32xf32>
    %87 = vector.extract_strided_slice %7 {offsets = [8, 0], sizes = [8, 32], strides = [1, 1]} : vector<16x128xf32> to vector<8x32xf32>
    %88 = vector.extract_strided_slice %8 {offsets = [8, 0], sizes = [8, 32], strides = [1, 1]} : vector<16x128xf32> to vector<8x32xf32>
    %89 = tpu.transpose %87, [1, 0] : vector<8x32xf32> -> vector<32x8xf32>
    %cst_29 = arith.constant dense<0.000000e+00> : vector<8x8xf32>
    %90 = tpu.matmul %86, %89, %cst_29 {dimension_numbers = #tpu.dot_dimension_numbers<[1], [0], [0], [1], [0, 0, 1, 1], [], []>} : vector<8x32xf32>, vector<32x8xf32>, vector<8x8xf32> -> vector<8x8xf32>
    %cst_30 = arith.constant 0.176776692 : f32
    %91 = vector.broadcast %cst_30 : f32 to vector<8x8xf32>
    %92 = arith.mulf %90, %91 : vector<8x8xf32>
    %cst_31 = arith.constant dense<0xFF800000> : vector<8xf32>
    %93 = vector.multi_reduction <maximumf>, %92, %cst_31 [1] : vector<8x8xf32> to vector<8xf32>
    %cst_32 = arith.constant 0xFF800000 : f32
    %94 = vector.broadcast %cst_32 : f32 to vector<8xf32>
    %95 = arith.maximumf %94, %93 : vector<8xf32>
    %96 = vector.shape_cast %95 : vector<8xf32> to vector<8x1xf32>
    %97 = vector.broadcast %96 : vector<8x1xf32> to vector<8x8xf32>
    %98 = arith.subf %92, %97 : vector<8x8xf32>
    %99 = math.exp %98 : vector<8x8xf32>
    %cst_33 = arith.constant dense<0.000000e+00> : vector<8xf32>
    %100 = vector.multi_reduction <add>, %99, %cst_33 [1] : vector<8x8xf32> to vector<8xf32>
    %101 = vector.shape_cast %100 : vector<8xf32> to vector<8x1xf32>
    %102 = vector.broadcast %101 : vector<8x1xf32> to vector<8x8xf32>
    %103 = arith.divf %99, %102 : vector<8x8xf32>
    %cst_34 = arith.constant dense<0.000000e+00> : vector<8x32xf32>
    %104 = tpu.matmul %103, %88, %cst_34 {dimension_numbers = #tpu.dot_dimension_numbers<[1], [0], [0], [1], [0, 0, 1, 1], [], []>} : vector<8x8xf32>, vector<8x32xf32>, vector<8x32xf32> -> vector<8x32xf32>
    %105 = vector.extract_strided_slice %6 {offsets = [8, 32], sizes = [8, 32], strides = [1, 1]} : vector<16x128xf32> to vector<8x32xf32>
    %106 = vector.extract_strided_slice %7 {offsets = [8, 32], sizes = [8, 32], strides = [1, 1]} : vector<16x128xf32> to vector<8x32xf32>
    %107 = vector.extract_strided_slice %8 {offsets = [8, 32], sizes = [8, 32], strides = [1, 1]} : vector<16x128xf32> to vector<8x32xf32>
    %108 = tpu.transpose %106, [1, 0] : vector<8x32xf32> -> vector<32x8xf32>
    %cst_35 = arith.constant dense<0.000000e+00> : vector<8x8xf32>
    %109 = tpu.matmul %105, %108, %cst_35 {dimension_numbers = #tpu.dot_dimension_numbers<[1], [0], [0], [1], [0, 0, 1, 1], [], []>} : vector<8x32xf32>, vector<32x8xf32>, vector<8x8xf32> -> vector<8x8xf32>
    %cst_36 = arith.constant 0.176776692 : f32
    %110 = vector.broadcast %cst_36 : f32 to vector<8x8xf32>
    %111 = arith.mulf %109, %110 : vector<8x8xf32>
    %cst_37 = arith.constant dense<0xFF800000> : vector<8xf32>
    %112 = vector.multi_reduction <maximumf>, %111, %cst_37 [1] : vector<8x8xf32> to vector<8xf32>
    %cst_38 = arith.constant 0xFF800000 : f32
    %113 = vector.broadcast %cst_38 : f32 to vector<8xf32>
    %114 = arith.maximumf %113, %112 : vector<8xf32>
    %115 = vector.shape_cast %114 : vector<8xf32> to vector<8x1xf32>
    %116 = vector.broadcast %115 : vector<8x1xf32> to vector<8x8xf32>
    %117 = arith.subf %111, %116 : vector<8x8xf32>
    %118 = math.exp %117 : vector<8x8xf32>
    %cst_39 = arith.constant dense<0.000000e+00> : vector<8xf32>
    %119 = vector.multi_reduction <add>, %118, %cst_39 [1] : vector<8x8xf32> to vector<8xf32>
    %120 = vector.shape_cast %119 : vector<8xf32> to vector<8x1xf32>
    %121 = vector.broadcast %120 : vector<8x1xf32> to vector<8x8xf32>
    %122 = arith.divf %118, %121 : vector<8x8xf32>
    %cst_40 = arith.constant dense<0.000000e+00> : vector<8x32xf32>
    %123 = tpu.matmul %122, %107, %cst_40 {dimension_numbers = #tpu.dot_dimension_numbers<[1], [0], [0], [1], [0, 0, 1, 1], [], []>} : vector<8x8xf32>, vector<8x32xf32>, vector<8x32xf32> -> vector<8x32xf32>
    %124 = vector.extract_strided_slice %6 {offsets = [8, 64], sizes = [8, 32], strides = [1, 1]} : vector<16x128xf32> to vector<8x32xf32>
    %125 = vector.extract_strided_slice %7 {offsets = [8, 64], sizes = [8, 32], strides = [1, 1]} : vector<16x128xf32> to vector<8x32xf32>
    %126 = vector.extract_strided_slice %8 {offsets = [8, 64], sizes = [8, 32], strides = [1, 1]} : vector<16x128xf32> to vector<8x32xf32>
    %127 = tpu.transpose %125, [1, 0] : vector<8x32xf32> -> vector<32x8xf32>
    %cst_41 = arith.constant dense<0.000000e+00> : vector<8x8xf32>
    %128 = tpu.matmul %124, %127, %cst_41 {dimension_numbers = #tpu.dot_dimension_numbers<[1], [0], [0], [1], [0, 0, 1, 1], [], []>} : vector<8x32xf32>, vector<32x8xf32>, vector<8x8xf32> -> vector<8x8xf32>
    %cst_42 = arith.constant 0.176776692 : f32
    %129 = vector.broadcast %cst_42 : f32 to vector<8x8xf32>
    %130 = arith.mulf %128, %129 : vector<8x8xf32>
    %cst_43 = arith.constant dense<0xFF800000> : vector<8xf32>
    %131 = vector.multi_reduction <maximumf>, %130, %cst_43 [1] : vector<8x8xf32> to vector<8xf32>
    %cst_44 = arith.constant 0xFF800000 : f32
    %132 = vector.broadcast %cst_44 : f32 to vector<8xf32>
    %133 = arith.maximumf %132, %131 : vector<8xf32>
    %134 = vector.shape_cast %133 : vector<8xf32> to vector<8x1xf32>
    %135 = vector.broadcast %134 : vector<8x1xf32> to vector<8x8xf32>
    %136 = arith.subf %130, %135 : vector<8x8xf32>
    %137 = math.exp %136 : vector<8x8xf32>
    %cst_45 = arith.constant dense<0.000000e+00> : vector<8xf32>
    %138 = vector.multi_reduction <add>, %137, %cst_45 [1] : vector<8x8xf32> to vector<8xf32>
    %139 = vector.shape_cast %138 : vector<8xf32> to vector<8x1xf32>
    %140 = vector.broadcast %139 : vector<8x1xf32> to vector<8x8xf32>
    %141 = arith.divf %137, %140 : vector<8x8xf32>
    %cst_46 = arith.constant dense<0.000000e+00> : vector<8x32xf32>
    %142 = tpu.matmul %141, %126, %cst_46 {dimension_numbers = #tpu.dot_dimension_numbers<[1], [0], [0], [1], [0, 0, 1, 1], [], []>} : vector<8x8xf32>, vector<8x32xf32>, vector<8x32xf32> -> vector<8x32xf32>
    %143 = vector.extract_strided_slice %6 {offsets = [8, 96], sizes = [8, 32], strides = [1, 1]} : vector<16x128xf32> to vector<8x32xf32>
    %144 = vector.extract_strided_slice %7 {offsets = [8, 96], sizes = [8, 32], strides = [1, 1]} : vector<16x128xf32> to vector<8x32xf32>
    %145 = vector.extract_strided_slice %8 {offsets = [8, 96], sizes = [8, 32], strides = [1, 1]} : vector<16x128xf32> to vector<8x32xf32>
    %146 = tpu.transpose %144, [1, 0] : vector<8x32xf32> -> vector<32x8xf32>
    %cst_47 = arith.constant dense<0.000000e+00> : vector<8x8xf32>
    %147 = tpu.matmul %143, %146, %cst_47 {dimension_numbers = #tpu.dot_dimension_numbers<[1], [0], [0], [1], [0, 0, 1, 1], [], []>} : vector<8x32xf32>, vector<32x8xf32>, vector<8x8xf32> -> vector<8x8xf32>
    %cst_48 = arith.constant 0.176776692 : f32
    %148 = vector.broadcast %cst_48 : f32 to vector<8x8xf32>
    %149 = arith.mulf %147, %148 : vector<8x8xf32>
    %cst_49 = arith.constant dense<0xFF800000> : vector<8xf32>
    %150 = vector.multi_reduction <maximumf>, %149, %cst_49 [1] : vector<8x8xf32> to vector<8xf32>
    %cst_50 = arith.constant 0xFF800000 : f32
    %151 = vector.broadcast %cst_50 : f32 to vector<8xf32>
    %152 = arith.maximumf %151, %150 : vector<8xf32>
    %153 = vector.shape_cast %152 : vector<8xf32> to vector<8x1xf32>
    %154 = vector.broadcast %153 : vector<8x1xf32> to vector<8x8xf32>
    %155 = arith.subf %149, %154 : vector<8x8xf32>
    %156 = math.exp %155 : vector<8x8xf32>
    %cst_51 = arith.constant dense<0.000000e+00> : vector<8xf32>
    %157 = vector.multi_reduction <add>, %156, %cst_51 [1] : vector<8x8xf32> to vector<8xf32>
    %158 = vector.shape_cast %157 : vector<8xf32> to vector<8x1xf32>
    %159 = vector.broadcast %158 : vector<8x1xf32> to vector<8x8xf32>
    %160 = arith.divf %156, %159 : vector<8x8xf32>
    %cst_52 = arith.constant dense<0.000000e+00> : vector<8x32xf32>
    %161 = tpu.matmul %160, %145, %cst_52 {dimension_numbers = #tpu.dot_dimension_numbers<[1], [0], [0], [1], [0, 0, 1, 1], [], []>} : vector<8x8xf32>, vector<8x32xf32>, vector<8x32xf32> -> vector<8x32xf32>
    %162 = tpu.concatenate %104, %123, %142, %161 in 1 : vector<8x32xf32>, vector<8x32xf32>, vector<8x32xf32>, vector<8x32xf32> -> vector<8x128xf32>
    %163 = tpu.concatenate %85, %162 in 0 : vector<8x128xf32>, vector<8x128xf32> -> vector<16x128xf32>
    %c0_53 = arith.constant 0 : index
    %c0_54 = arith.constant 0 : index
    %164 = vector.load %arg3[%c0_53, %c0_54] : memref<128x128xf32, #tpu.memory_space<vmem>>, vector<128x128xf32>
    %cst_55 = arith.constant dense<0.000000e+00> : vector<16x128xf32>
    %165 = tpu.matmul %163, %164, %cst_55 {dimension_numbers = #tpu.dot_dimension_numbers<[1], [0], [0], [1], [0, 0, 1, 1], [], []>} : vector<16x128xf32>, vector<128x128xf32>, vector<16x128xf32> -> vector<16x128xf32>
    %c0_56 = arith.constant 0 : index
    %c0_57 = arith.constant 0 : index
    %166 = vector.load %arg4[%c0_56, %c0_57] : memref<1x128xf32, #tpu.memory_space<vmem>>, vector<1x128xf32>
    %167 = vector.broadcast %166 : vector<1x128xf32> to vector<16x128xf32>
    %168 = arith.addf %165, %167 : vector<16x128xf32>
    %c0_58 = arith.constant 0 : index
    %c0_59 = arith.constant 0 : index
    %169 = vector.load %arg5[%c0_58, %c0_59] : memref<16x128xf32, #tpu.memory_space<vmem>>, vector<16x128xf32>
    tpu.vector_store %arg5[%c0_58, %c0_59], %168 {strides = array<i32>} : memref<16x128xf32, #tpu.memory_space<vmem>>, vector<16x128xf32>,
    return
  }
}

</mosaic_0001>

<bundles_post_ra>
// kernel: multihead_attention.1
= control target key start
LH: loop header
LB: loop body
LE: loop exit
PB: predicated region body
PF: predicated region fallthrough
CT: control target
= control target key end

     0   :  { %10 = vsyncpa [#allocation3], 0  ;;  %s2903_s0 = inlined_call_operand.vmem [shape: f32[16,384], index: 0, kind: input, shape index: {}]   ;;  %s2904_s1 = inlined_call_operand.hbm [shape: f32[384,384], index: 1, kind: input, shape index: {}]   ;;  %s2905_s2 = inlined_call_operand.vmem [shape: f32[1,384], index: 2, kind: input, shape index: {}]   ;;  %s2906_s3 = inlined_call_operand.hbm [shape: f32[128,128], index: 3, kind: input, shape index: {}]   ;;  %s2907_s4 = inlined_call_operand.vmem [shape: f32[1,128], index: 4, kind: input, shape index: {}]   ;;  %s2908_s5 = inlined_call_operand.hbm [shape: f32[16,128], index: 5, kind: output, shape index: {}]  }
   0x1   :  { %11 = vsyncpa [#allocation6], 0 }
   0x2   :  { %12 = vsyncpa [#allocation4], 0  ;;  %s2604_s18 = smov [#allocation2]   ;;  %s2532_s22 = scalar_lea.hbm %s2904_s1, 18432 }
   0x3   :  { %s20_s19 = sshll.u32 %s2604_s18, 4  ;;  %p2533_p0 = scmp.ne.s32.totalorder %s2904_s1, %s2532_s22  ;;  %s21_s19 = int_to_ptr.vmem [resolvable:$true] %s20_s19 }
   0x4   :  { %p2536_p1 = scmp.lt.u32.totalorder %s2532_s22, %s2904_s1 }
   0x6   :  { %p2538_p2 = pnand %p2536_p1, %p2533_p0 }
   0x8   :  { %2541 = shalt.err (!%p2538_p2)
}
   0x9   :  { %s2542_s27 = scalar_lea.vmem %s21_s19, 18432  ;;  %p2547_p4 = scmp.lt.s32.totalorder %s21_s19, %s21_s19 }
   0xa   :  { %p2543_p3 = scmp.ne.s32.totalorder %s21_s19, %s2542_s27  ;;  %p2548_p5 = scmp.lt.s32.totalorder %s2542_s27, %s2542_s27 }
   0xc   :  { %p2549_p6 = por %p2548_p5, %p2547_p4 }
   0xe   :  { %p2550_p7 = pnand %p2549_p6, %p2543_p3 }
  0x10   :  { %2553 = shalt.err (!%p2550_p7)
}
  0x11   :  { %s2605_s28 = smov 384   ;;  %s2606_s29 = smov 24  }
  0x12   :  { %26 = dma.hbm_to_vmem [thread:$0]  %s2904_s1, 18432, %s21_s19, [#allocation3], %s2605_s28, %s2605_s28, %s2606_s29  }
  0x13   :  { %s2607_s7 = smov [#allocation5]   ;;  %s2554_s11 = scalar_lea.hbm %s2906_s3, 2048 }
  0x14   :  { %s34_s8 = sshll.u32 %s2607_s7, 4  ;;  %p2555_p8 = scmp.ne.s32.totalorder %s2906_s3, %s2554_s11  ;;  %s35_s8 = int_to_ptr.vmem [resolvable:$true] %s34_s8 }
  0x15   :  { %p2558_p9 = scmp.lt.u32.totalorder %s2554_s11, %s2906_s3 }
  0x17   :  { %p2560_p10 = pnand %p2558_p9, %p2555_p8 }
  0x19   :  { %2563 = shalt.err (!%p2560_p10)
}
  0x1a   :  { %s2564_s16 = scalar_lea.vmem %s35_s8, 2048  ;;  %p2569_p12 = scmp.lt.s32.totalorder %s35_s8, %s35_s8 }
  0x1b   :  { %p2565_p11 = scmp.ne.s32.totalorder %s35_s8, %s2564_s16  ;;  %p2570_p13 = scmp.lt.s32.totalorder %s2564_s16, %s2564_s16 }
  0x1d   :  { %p2571_p0 = por %p2570_p13, %p2569_p12 }
  0x1f   :  { %p2572_p1 = pnand %p2571_p0, %p2565_p11 }
  0x21   :  { %2575 = shalt.err (!%p2572_p1)
}
  0x22   :  { %s2608_s1 = smov 128   ;;  %s2609_s17 = smov 8  }
  0x23   :  { %40 = dma.hbm_to_vmem [thread:$0]  %s2906_s3, 2048, %s35_s8, [#allocation6], %s2608_s1, %s2608_s1, %s2609_s17  }
  0x24   :  { %2598 = dma.done.wait [#allocation3], 18432  }
  0x25   :  { %2599 = vsyncadd [#allocation3], 4294948864 }
  0x26   :  { %2600 = dma.done.wait [#allocation6], 2048  }
  0x27   :  { %2601 = vsyncadd [#allocation6], 4294965248  ;;  %v56_v0 = vld [vmem:[#allocation2 + $0x8] sm:$0xff]  ;;  %v59_v1 = vld [vmem:[#allocation2 + $0x20] sm:$0xff]  ;;  %vm2611_vm0 = vmmov 0   ;;  %vm520_vm1 = vcmask 261120  }
  0x28   :  { %v55_v2 = vld [vmem:[#allocation2] sm:$0xff]  ;;  %v2273_v3 = vpack.c.bf16 %v59_v1, %v56_v0  ;;  %v58_v4 = vld [vmem:[#allocation2 + $0x18] sm:$0xff]  ;;  %v65_v6 = vld [vmem:[#allocation2 + $0x50] sm:$0xff]  ;;  %vm598_vm2 = vcmask 64512   ;;  %s2614_s8 = smov 32   ;;  %vm1195_vm3 = vcmask 523264  }
  0x29   :  { %v62_v5 = vld [vmem:[#allocation2 + $0x38] sm:$0xff]  ;;  %v2275_v7 = vpack.c.bf16 %v58_v4, %v55_v2  ;;  %v61_v9 = vld [vmem:[#allocation2 + $0x30] sm:$0xff]  ;;  %v64_v10 = vld [vmem:[#allocation2 + $0x48] sm:$0xff]  ;;  %vm1197_vm4 = vcmask 785408   ;;  %s2615_s11 = smov [#allocation7]  }
  0x2a   :  { %v2277_v8 = vpack.c.bf16 %v65_v6, %v62_v5  ;;  %v68_v11 = vld [vmem:[#allocation2 + $0x68] sm:$0xff]  ;;  %2274 = vmatprep.subr.bf16.mxu0 %v2273_v3  ;;  %v71_v12 = vld [vmem:[#allocation2 + $0x80] sm:$0xff]  ;;  %v2279_v13 = vpack.c.bf16 %v64_v10, %v61_v9  ;;  %v70_v16 = vld [vmem:[#allocation2 + $0x78] sm:$0xff]  ;;  %s1979_s12 = sshll.u32 %s2615_s11, 4  ;;  %s1980_s12 = int_to_ptr.vmem [resolvable:$true] %s1979_s12 }
  0x2b   :  { %2276 = vmatpush1.bf16.msra.mxu0 %v2275_v7  ;;  %v2281_v14 = vpack.c.bf16 %v71_v12, %v68_v11  ;;  %v67_v15 = vld [vmem:[#allocation2 + $0x60] sm:$0xff]  ;;  %v74_v17 = vld [vmem:[#allocation2 + $0x98] sm:$0xff]  ;;  %v77_v18 = vld [vmem:[#allocation2 + $0xb0] sm:$0xff]  ;;  %s2576_s13 = scalar_lea.vmem %s1980_s12, 256  ;;  %p2581_p3 = scmp.lt.s32.totalorder %s1980_s12, %s1980_s12 }
  0x2c   :  { %2278 = vmatprep.subr.bf16.mxu0 %v2277_v8  ;;  %v2283_v19 = vpack.c.bf16 %v70_v16, %v67_v15  ;;  %v2285_v20 = vpack.c.bf16 %v77_v18, %v74_v17  ;;  %v73_v21 = vld [vmem:[#allocation2 + $0x90] sm:$0xff]  ;;  %v76_v22 = vld [vmem:[#allocation2 + $0xa8] sm:$0xff]  ;;  %v83_v24 = vld [vmem:[#allocation2 + $0xe0] sm:$0xff]  ;;  %p2577_p2 = scmp.ne.s32.totalorder %s1980_s12, %s2576_s13  ;;  %p2582_p4 = scmp.lt.s32.totalorder %s2576_s13, %s2576_s13 }
  0x2d   :  { %v80_v23 = vld [vmem:[#allocation2 + $0xc8] sm:$0xff]  ;;  %v2287_v25 = vpack.c.bf16 %v76_v22, %v73_v21  ;;  %v79_v27 = vld [vmem:[#allocation2 + $0xc0] sm:$0xff]  ;;  %v82_v28 = vld [vmem:[#allocation2 + $0xd8] sm:$0xff] }
  0x2e   :  { %v2289_v26 = vpack.c.bf16 %v83_v24, %v80_v23  ;;  %v86_v29 = vld [vmem:[#allocation2 + $0xf8] sm:$0xff]  ;;  %v89_v30 = vld [vmem:[#allocation2 + $0x110] sm:$0xff]  ;;  %v2291_v31 = vpack.c.bf16 %v82_v28, %v79_v27  ;;  %v88_v34 = vld [vmem:[#allocation2 + $0x108] sm:$0xff]  ;;  %p2583_p5 = por %p2582_p4, %p2581_p3 }
  0x2f   :  { %2280 = vmatpush1.bf16.msra.mxu0 %v2279_v13  ;;  %v2293_v32 = vpack.c.bf16 %v89_v30, %v86_v29  ;;  %v85_v33 = vld [vmem:[#allocation2 + $0xf0] sm:$0xff]  ;;  %v92_v35 = vld [vmem:[#allocation2 + $0x128] sm:$0xff]  ;;  %v95_v36 = vld [vmem:[#allocation2 + $0x140] sm:$0xff] }
  0x30   :  { %2282 = vmatprep.subr.bf16.mxu0 %v2281_v14  ;;  %v2295_v37 = vpack.c.bf16 %v88_v34, %v85_v33  ;;  %v2297_v38 = vpack.c.bf16 %v95_v36, %v92_v35  ;;  %v91_v39 = vld [vmem:[#allocation2 + $0x120] sm:$0xff]  ;;  %v94_v40 = vld [vmem:[#allocation2 + $0x138] sm:$0xff]  ;;  %v50_v41 = vld [vmem:[%s2903_s0 + $0x8] sm:$0xff]  ;;  %p2584_p6 = pnand %p2583_p5, %p2577_p2 }
  0x31   :  { %v98_v42 = vld [vmem:[#allocation2 + $0x158] sm:$0xff]  ;;  %v101_v43 = vld [vmem:[#allocation2 + $0x170] sm:$0xff]  ;;  %280 = vmatprep.mubr.f32.mxu0 %v50_v41  ;;  %434 = vmatprep.mubr.f32.mxu1 %v50_v41  ;;  %v2299_v44 = vpack.c.bf16 %v94_v40, %v91_v39  ;;  %v100_v47 = vld [vmem:[#allocation2 + $0x168] sm:$0xff] }
  0x32   :  { %v2301_v45 = vpack.c.bf16 %v101_v43, %v98_v42  ;;  %v97_v46 = vld [vmem:[#allocation2 + $0x150] sm:$0xff]  ;;  %v104_v48 = vld [vmem:[#allocation2 + $0x188] sm:$0xff]  ;;  %v107_v49 = vld [vmem:[#allocation2 + $0x1a0] sm:$0xff] }
  0x33   :  { %2284 = vmatpush1.bf16.msra.mxu0 %v2283_v19  ;;  %v2303_v50 = vpack.c.bf16 %v100_v47, %v97_v46  ;;  %v2305_v51 = vpack.c.bf16 %v107_v49, %v104_v48  ;;  %v103_v52 = vld [vmem:[#allocation2 + $0x180] sm:$0xff]  ;;  %v106_v53 = vld [vmem:[#allocation2 + $0x198] sm:$0xff]  ;;  %v113_v55 = vld [vmem:[#allocation2 + $0x1d0] sm:$0xff] }
  0x34   :  { %2286 = vmatprep.subr.bf16.mxu0 %v2285_v20  ;;  %v110_v54 = vld [vmem:[#allocation2 + $0x1b8] sm:$0xff]  ;;  %v2307_v56 = vpack.c.bf16 %v106_v53, %v103_v52  ;;  %v109_v58 = vld [vmem:[#allocation2 + $0x1b0] sm:$0xff]  ;;  %v112_v59 = vld [vmem:[#allocation2 + $0x1c8] sm:$0xff] }
  0x35   :  { %v2309_v57 = vpack.c.bf16 %v113_v55, %v110_v54  ;;  %v116_v60 = vld [vmem:[#allocation2 + $0x1e8] sm:$0xff]  ;;  %v119_v61 = vld [vmem:[#allocation2 + $0x200] sm:$0xff]  ;;  %v2311_v62 = vpack.c.bf16 %v112_v59, %v109_v58  ;;  %v118_v1 = vld [vmem:[#allocation2 + $0x1f8] sm:$0xff] }
  0x36   :  { %v2313_v63 = vpack.c.bf16 %v119_v61, %v116_v60  ;;  %v115_v0 = vld [vmem:[#allocation2 + $0x1e0] sm:$0xff]  ;;  %v122_v2 = vld [vmem:[#allocation2 + $0x218] sm:$0xff]  ;;  %v125_v3 = vld [vmem:[#allocation2 + $0x230] sm:$0xff] }
  0x37   :  { %2288 = vmatpush1.bf16.msra.mxu0 %v2287_v25  ;;  %v2315_v4 = vpack.c.bf16 %v118_v1, %v115_v0  ;;  %v2317_v5 = vpack.c.bf16 %v125_v3, %v122_v2  ;;  %v121_v6 = vld [vmem:[#allocation2 + $0x210] sm:$0xff]  ;;  %v124_v7 = vld [vmem:[#allocation2 + $0x228] sm:$0xff]  ;;  %v131_v9 = vld [vmem:[#allocation2 + $0x260] sm:$0xff] }
  0x38   :  { %2290 = vmatprep.subr.bf16.mxu0 %v2289_v26  ;;  %v128_v8 = vld [vmem:[#allocation2 + $0x248] sm:$0xff]  ;;  %v2319_v10 = vpack.c.bf16 %v124_v7, %v121_v6  ;;  %v127_v12 = vld [vmem:[#allocation2 + $0x240] sm:$0xff]  ;;  %v130_v13 = vld [vmem:[#allocation2 + $0x258] sm:$0xff] }
  0x39   :  { %v2321_v11 = vpack.c.bf16 %v131_v9, %v128_v8  ;;  %v134_v14 = vld [vmem:[#allocation2 + $0x278] sm:$0xff]  ;;  %v137_v15 = vld [vmem:[#allocation2 + $0x290] sm:$0xff]  ;;  %v2323_v16 = vpack.c.bf16 %v130_v13, %v127_v12  ;;  %v136_v19 = vld [vmem:[#allocation2 + $0x288] sm:$0xff] }
  0x3a   :  { %v2325_v17 = vpack.c.bf16 %v137_v15, %v134_v14  ;;  %v133_v18 = vld [vmem:[#allocation2 + $0x270] sm:$0xff]  ;;  %v140_v20 = vld [vmem:[#allocation2 + $0x2a8] sm:$0xff]  ;;  %v143_v21 = vld [vmem:[#allocation2 + $0x2c0] sm:$0xff] }
  0x3b   :  { %2292 = vmatpush1.bf16.msra.mxu0 %v2291_v31  ;;  %v2327_v22 = vpack.c.bf16 %v136_v19, %v133_v18  ;;  %v2329_v23 = vpack.c.bf16 %v143_v21, %v140_v20  ;;  %v139_v24 = vld [vmem:[#allocation2 + $0x2a0] sm:$0xff]  ;;  %v142_v25 = vld [vmem:[#allocation2 + $0x2b8] sm:$0xff]  ;;  %v149_v27 = vld [vmem:[#allocation2 + $0x2f0] sm:$0xff] }
  0x3c   :  { %2294 = vmatprep.subr.bf16.mxu0 %v2293_v32  ;;  %v146_v26 = vld [vmem:[#allocation2 + $0x2d8] sm:$0xff]  ;;  %v2331_v28 = vpack.c.bf16 %v142_v25, %v139_v24  ;;  %v145_v30 = vld [vmem:[#allocation2 + $0x2d0] sm:$0xff]  ;;  %v148_v31 = vld [vmem:[#allocation2 + $0x2e8] sm:$0xff] }
  0x3d   :  { %v2333_v29 = vpack.c.bf16 %v149_v27, %v146_v26  ;;  %v152_v32 = vld [vmem:[#allocation2 + $0x308] sm:$0xff]  ;;  %v155_v33 = vld [vmem:[#allocation2 + $0x320] sm:$0xff]  ;;  %v2335_v34 = vpack.c.bf16 %v148_v31, %v145_v30  ;;  %v161_v39 = vld [vmem:[#allocation2 + $0x350] sm:$0xff] }
  0x3e   :  { %v2337_v35 = vpack.c.bf16 %v155_v33, %v152_v32  ;;  %v151_v36 = vld [vmem:[#allocation2 + $0x300] sm:$0xff]  ;;  %v157_v43 = vld [vmem:[#allocation2 + $0x330] sm:$0xff]  ;;  %v164_v46 = vld [vmem:[#allocation2 + $0x368] sm:$0xff] }
  0x3f   :  { %2296 = vmatpush1.bf16.msra.mxu0 %v2295_v37  ;;  %v154_v37 = vld [vmem:[#allocation2 + $0x318] sm:$0xff]  ;;  %v2679_v40 = vld [vmem:[%s2903_s0] sm:$0xff]  ;;  %v173_v54 = vld [vmem:[#allocation2 + $0x3b0] sm:$0xff] }
  0x40   :  { %2298 = vmatprep.subr.bf16.mxu0 %v2297_v38  ;;  %v158_v38 = vld [vmem:[#allocation2 + $0x338] sm:$0xff]  ;;  %v2339_v41 = vpack.c.bf16 %v154_v37, %v151_v36  ;;  %v167_v47 = vld [vmem:[#allocation2 + $0x380] sm:$0xff]  ;;  %v169_v58 = vld [vmem:[#allocation2 + $0x390] sm:$0xff] }
  0x41   :  { %v2341_v42 = vpack.c.bf16 %v161_v39, %v158_v38  ;;  %v2691_v49 = vld [vmem:[%s2903_s0 + $0x18] sm:$0xff]  ;;  %v172_v59 = vld [vmem:[#allocation2 + $0x3a8] sm:$0xff]  ;;  %v179_v61 = vld [vmem:[#allocation2 + $0x3e0] sm:$0xff] }
  0x42   :  { %v166_v52 = vld [vmem:[#allocation2 + $0x378] sm:$0xff]  ;;  %v176_v60 = vld [vmem:[#allocation2 + $0x3c8] sm:$0xff]  ;;  %v175_v0 = vld [vmem:[#allocation2 + $0x3c0] sm:$0xff] }
  0x43   :  { %2300 = vmatpush1.bf16.msra.mxu0 %v2299_v44  ;;  %v160_v44 = vld [vmem:[#allocation2 + $0x348] sm:$0xff]  ;;  %v170_v53 = vld [vmem:[#allocation2 + $0x398] sm:$0xff]  ;;  %v185_v3 = vld [vmem:[#allocation2 + $0x410] sm:$0xff] }
  0x44   :  { %2302 = vmatprep.subr.bf16.mxu0 %v2301_v45  ;;  %v2684_v45 = vld [vmem:[%s2903_s0 + $0x20] sm:$0xff]  ;;  %v2343_v48 = vpack.c.bf16 %v160_v44, %v157_v43  ;;  %v178_v1 = vld [vmem:[#allocation2 + $0x3d8] sm:$0xff]  ;;  %v181_v6 = vld [vmem:[#allocation2 + $0x3f0] sm:$0xff] }
  0x45   :  { %v182_v2 = vld [vmem:[#allocation2 + $0x3f8] sm:$0xff]  ;;  %v184_v7 = vld [vmem:[#allocation2 + $0x408] sm:$0xff]  ;;  %v191_v9 = vld [vmem:[#allocation2 + $0x440] sm:$0xff] }
  0x46   :  { %v188_v8 = vld [vmem:[#allocation2 + $0x428] sm:$0xff]  ;;  %v187_v12 = vld [vmem:[#allocation2 + $0x420] sm:$0xff]  ;;  %v190_v13 = vld [vmem:[#allocation2 + $0x438] sm:$0xff] }
  0x47   :  { %2304 = vmatpush1.bf16.msra.mxu0 %v2303_v50  ;;  %v2345_v50 = vpack.c.bf16 %v167_v47, %v164_v46  ;;  %v194_v14 = vld [vmem:[#allocation2 + $0x458] sm:$0xff]  ;;  %v197_v15 = vld [vmem:[#allocation2 + $0x470] sm:$0xff]  ;;  %v196_v19 = vld [vmem:[#allocation2 + $0x468] sm:$0xff] }
  0x48   :  { %2306 = vmatprep.subr.bf16.mxu0 %v2305_v51  ;;  %v163_v51 = vld [vmem:[#allocation2 + $0x360] sm:$0xff]  ;;  %v193_v18 = vld [vmem:[#allocation2 + $0x450] sm:$0xff]  ;;  %v108_v39 = vld [vmem:[#allocation2 + $0x1a8] sm:$0xff] }
  0x49   :  { %v2347_v55 = vpack.c.bf16 %v166_v52, %v163_v51  ;;  %v2367_v20 = vpack.c.bf16 %v196_v19, %v193_v18  ;;  %v2698_v21 = vld [vmem:[%s2903_s0 + $0x10] sm:$0xff]  ;;  %v2717_v26 = vld [vmem:[%s2905_s2] sm:$0x7]  ;;  %v60_v43 = vld [vmem:[#allocation2 + $0x28] sm:$0xff]  ;;  %s2613_s2 = smov 64  }
  0x4a   :  { %v105_v38 = vld [vmem:[#allocation2 + $0x190] sm:$0xff]  ;;  %v111_v46 = vld [vmem:[#allocation2 + $0x1c0] sm:$0xff]  ;;  %v114_v47 = vld [vmem:[#allocation2 + $0x1d8] sm:$0xff] }
  0x4b   :  { %2308 = vmatpush1.bf16.msra.mxu0 %v2307_v56  ;;  %v2610_v56 = vmov 0.0   ;;  %v66_v51 = vld [vmem:[#allocation2 + $0x58] sm:$0xff]  ;;  %v117_v52 = vld [vmem:[#allocation2 + $0x1f0] sm:$0xff]  ;;  %v96_v18 = vld [vmem:[#allocation2 + $0x148] sm:$0xff] }
  0x4c   :  { %2310 = vmatprep.subr.bf16.mxu0 %v2309_v57  ;;  %v2349_v57 = vpack.c.bf16 %v173_v54, %v170_v53  ;;  %v120_v53 = vld [vmem:[#allocation2 + $0x208] sm:$0xff]  ;;  %v147_v19 = vld [vmem:[#allocation2 + $0x2e0] sm:$0xff] }
  0x4f   :  { %2312 = vmatpush1.bf16.msra.mxu0 %v2311_v62  ;;  %v2351_v62 = vpack.c.bf16 %v172_v59, %v169_v58  ;;  %v72_v58 = vld [vmem:[#allocation2 + $0x88] sm:$0xff]  ;;  %v123_v59 = vld [vmem:[#allocation2 + $0x220] sm:$0xff] }
  0x50   :  { %2314 = vmatprep.subr.bf16.mxu0 %v2313_v63  ;;  %v2353_v63 = vpack.c.bf16 %v179_v61, %v176_v60  ;;  %v126_v60 = vld [vmem:[#allocation2 + $0x238] sm:$0xff] }
  0x53   :  { %2316 = vmatpush1.bf16.msra.mxu0 %v2315_v4  ;;  %v2355_v4 = vpack.c.bf16 %v178_v1, %v175_v0  ;;  %v78_v0 = vld [vmem:[#allocation2 + $0xb8] sm:$0xff]  ;;  %v129_v1 = vld [vmem:[#allocation2 + $0x250] sm:$0xff] }
  0x54   :  { %2318 = vmatprep.subr.bf16.mxu0 %v2317_v5  ;;  %v2357_v5 = vpack.c.bf16 %v185_v3, %v182_v2  ;;  %v132_v2 = vld [vmem:[#allocation2 + $0x268] sm:$0xff] }
  0x57   :  { %2320 = vmatpush1.bf16.msra.mxu0 %v2319_v10  ;;  %v2359_v10 = vpack.c.bf16 %v184_v7, %v181_v6  ;;  %v84_v6 = vld [vmem:[#allocation2 + $0xe8] sm:$0xff]  ;;  %v135_v7 = vld [vmem:[#allocation2 + $0x280] sm:$0xff] }
  0x58   :  { %2322 = vmatprep.subr.bf16.mxu0 %v2321_v11  ;;  %v2361_v11 = vpack.c.bf16 %v191_v9, %v188_v8  ;;  %v138_v8 = vld [vmem:[#allocation2 + $0x298] sm:$0xff] }
  0x5b   :  { %2324 = vmatpush1.bf16.msra.mxu0 %v2323_v16  ;;  %v2363_v16 = vpack.c.bf16 %v190_v13, %v187_v12  ;;  %v90_v12 = vld [vmem:[#allocation2 + $0x118] sm:$0xff]  ;;  %v141_v13 = vld [vmem:[#allocation2 + $0x2b0] sm:$0xff] }
  0x5c   :  { %2326 = vmatprep.subr.bf16.mxu0 %v2325_v17  ;;  %v2365_v17 = vpack.c.bf16 %v197_v15, %v194_v14  ;;  %v144_v14 = vld [vmem:[#allocation2 + $0x2c8] sm:$0xff] }
  0x5f   :  { %2328 = vmatpush1.bf16.msra.mxu0 %v2327_v22  ;;  %v2706_v22 = vld [vmem:[%s2903_s0 + $0x28] sm:$0xff]  ;;  %s2612_s0 = smov 96  }
  0x60   :  { %2330 = vmatprep.subr.bf16.mxu0 %v2329_v23  ;;  %v201_v23 = vlaneseq }
  0x62   :  { %v2711_v24 = vshrl.u32 %v201_v23, 7 }
  0x63   :  { %2332 = vmatpush1.bf16.msra.mxu0 %v2331_v28 }
  0x64   :  { %2334 = vmatprep.subr.bf16.mxu0 %v2333_v29  ;;  %v207_v25 = vsub.s32 1, %v2711_v24  ;;  %v203_v27 = vsub.s32 0, %v2711_v24 }
  0x66   :  { %v208_v28 = vrot.slane %v2717_v26, %v207_v25  ;;  %v204_v30 = vrot.slane %v2717_v26, %v203_v27  ;;  %v99_v27 = vld [vmem:[#allocation2 + $0x160] sm:$0xff] }
  0x67   :  { %2336 = vmatpush1.bf16.msra.mxu0 %v2335_v34 }
  0x68   :  { %2338 = vmatprep.subr.bf16.mxu0 %v2337_v35 }
  0x6a   :  { %281 = vmatmul.mubr.f32.vlgmr.msra.gmra.mrb[0].mxu0 %v2679_v40 }
  0x6b   :  { %2340 = vmatpush1.bf16.msra.mxu0 %v2339_v41  ;;  %286 = vmatprep.mubr.f32.mxu0 %v2684_v45  ;;  %v2369_v41 = vpack.c.bf16 %v108_v39, %v105_v38  ;;  %v162_v38 = vld [vmem:[#allocation2 + $0x358] sm:$0xff] }
  0x6c   :  { %2342 = vmatprep.subr.bf16.mxu0 %v2341_v42  ;;  %v57_v42 = vld [vmem:[#allocation2 + $0x10] sm:$0xff] }
  0x6d   :  { %v2371_v44 = vpack.c.bf16 %v60_v43, %v57_v42  ;;  %2370 = vmatprep.subr.bf16.mxu1 %v2369_v41  ;;  %v165_v41 = vld [vmem:[#allocation2 + $0x370] sm:$0xff]  ;;  %v168_v42 = vld [vmem:[#allocation2 + $0x388] sm:$0xff] }
  0x6e   :  { %287 = vmatmul.mubr.f32.gmra.mrb[2].mxu0 %v2691_v49  ;;  %v2409_v43 = vpack.c.bf16 %v168_v42, %v165_v41 }
  0x6f   :  { %2344 = vmatpush1.bf16.msra.mxu0 %v2343_v48  ;;  %357 = vmatprep.mubr.f32.mxu0 %v2610_v56  ;;  %v63_v48 = vld [vmem:[#allocation2 + $0x40] sm:$0xff] }
  0x70   :  { %2346 = vmatprep.subr.bf16.mxu0 %v2345_v50  ;;  %2372 = vmatpush3.bf16.msra.mxu1 %v2371_v44  ;;  %v2373_v50 = vpack.c.bf16 %v114_v47, %v111_v46  ;;  %v2375_v54 = vpack.c.bf16 %v66_v51, %v63_v48  ;;  %v171_v44 = vld [vmem:[#allocation2 + $0x3a0] sm:$0xff]  ;;  %v174_v46 = vld [vmem:[#allocation2 + $0x3b8] sm:$0xff]  ;;  %v177_v48 = vld [vmem:[#allocation2 + $0x3d0] sm:$0xff] }
  0x71   :  { %v2413_v47 = vpack.c.bf16 %v174_v46, %v171_v44 }
  0x72   :  { %2374 = vmatprep.subr.bf16.mxu1 %v2373_v50  ;;  %v180_v50 = vld [vmem:[#allocation2 + $0x3e8] sm:$0xff] }
  0x73   :  { %2348 = vmatpush1.bf16.msra.mxu0 %v2347_v55  ;;  %v2377_v55 = vpack.c.bf16 %v120_v53, %v117_v52  ;;  %v2417_v51 = vpack.c.bf16 %v180_v50, %v177_v48  ;;  %v186_v52 = vld [vmem:[#allocation2 + $0x418] sm:$0xff]  ;;  %v189_v53 = vld [vmem:[#allocation2 + $0x430] sm:$0xff] }
  0x74   :  { %2350 = vmatprep.subr.bf16.mxu0 %v2349_v57  ;;  %v69_v57 = vld [vmem:[#allocation2 + $0x70] sm:$0xff]  ;;  %2376 = vmatpush3.bf16.msra.mxu1 %v2375_v54  ;;  %v192_v54 = vld [vmem:[#allocation2 + $0x448] sm:$0xff] }
  0x75   :  { %v2379_v61 = vpack.c.bf16 %v72_v58, %v69_v57  ;;  %2378 = vmatprep.subr.bf16.mxu1 %v2377_v55  ;;  %v195_v55 = vld [vmem:[#allocation2 + $0x460] sm:$0xff]  ;;  %v198_v57 = vld [vmem:[#allocation2 + $0x478] sm:$0xff] }
  0x77   :  { %2352 = vmatpush1.bf16.msra.mxu0 %v2351_v62  ;;  %v2381_v62 = vpack.c.bf16 %v126_v60, %v123_v59 }
  0x78   :  { %2354 = vmatprep.subr.bf16.mxu0 %v2353_v63  ;;  %v75_v63 = vld [vmem:[#allocation2 + $0xa0] sm:$0xff]  ;;  %2380 = vmatpush3.bf16.msra.mxu1 %v2379_v61 }
  0x79   :  { %v2383_v3 = vpack.c.bf16 %v78_v0, %v75_v63  ;;  %2382 = vmatprep.subr.bf16.mxu1 %v2381_v62 }
  0x7b   :  { %2356 = vmatpush1.bf16.msra.mxu0 %v2355_v4  ;;  %v2385_v4 = vpack.c.bf16 %v132_v2, %v129_v1  ;;  %v211_v1 = vsub.s32 2, %v2711_v24 }
  0x7c   :  { %2358 = vmatprep.subr.bf16.mxu0 %v2357_v5  ;;  %v81_v5 = vld [vmem:[#allocation2 + $0xd0] sm:$0xff]  ;;  %2384 = vmatpush3.bf16.msra.mxu1 %v2383_v3 }
  0x7d   :  { %v2387_v9 = vpack.c.bf16 %v84_v6, %v81_v5  ;;  %2386 = vmatprep.subr.bf16.mxu1 %v2385_v4 }
  0x7f   :  { %2360 = vmatpush1.bf16.msra.mxu0 %v2359_v10  ;;  %v2389_v10 = vpack.c.bf16 %v138_v8, %v135_v7 }
  0x80   :  { %2362 = vmatprep.subr.bf16.mxu0 %v2361_v11  ;;  %v87_v11 = vld [vmem:[#allocation2 + $0x100] sm:$0xff]  ;;  %2388 = vmatpush3.bf16.msra.mxu1 %v2387_v9 }
  0x81   :  { %v2391_v15 = vpack.c.bf16 %v90_v12, %v87_v11  ;;  %2390 = vmatprep.subr.bf16.mxu1 %v2389_v10 }
  0x83   :  { %2364 = vmatpush1.bf16.msra.mxu0 %v2363_v16  ;;  %v2393_v16 = vpack.c.bf16 %v144_v14, %v141_v13 }
  0x84   :  { %2366 = vmatprep.subr.bf16.mxu0 %v2365_v17  ;;  %v93_v17 = vld [vmem:[#allocation2 + $0x130] sm:$0xff]  ;;  %2392 = vmatpush3.bf16.msra.mxu1 %v2391_v15 }
  0x85   :  { %v2395_v23 = vpack.c.bf16 %v96_v18, %v93_v17  ;;  %2394 = vmatprep.subr.bf16.mxu1 %v2393_v16 }
  0x87   :  { %2368 = vmatpush1.bf16.msra.mxu0 %v2367_v20  ;;  %v150_v20 = vld [vmem:[#allocation2 + $0x2f8] sm:$0xff] }
  0x88   :  { %2158 = vmatprep.subr.mxu0 %v2610_v56  ;;  %v2397_v25 = vpack.c.bf16 %v150_v20, %v147_v19  ;;  %2396 = vmatpush3.bf16.msra.mxu1 %v2395_v23 }
  0x8a   :  { %358 = vmatmul.mubr.f32.vlgmr.msra.gmra.mrb[0].mxu0 %v2698_v21  ;;  %2398 = vmatprep.subr.bf16.mxu1 %v2397_v25 }
  0x8b   :  { %363 = vmatprep.mubr.f32.mxu0 %v2610_v56 }
  0x8e   :  { %364 = vmatmul.mubr.f32.gmra.mrb[2].mxu0 %v2706_v22 }
  0x8f   :  { %2160 = vmatprep.mubr.msk.f32.mxu0 %vm2611_vm0, %v2610_v56 }
 0x15d   :  { %v359_v29 = vpop.f32.mrb[0].mxu0 }
 0x15e   :  { %v361_v31 = vpop.f32.mrb[1].mxu0  ;;  %v2728_v34 = vadd.f32 %v359_v29, %v204_v30  ;;  %v153_v29 = vld [vmem:[#allocation2 + $0x310] sm:$0xff] }
 0x15f   :  { %v2722_v32 = vadd.f32 %v361_v31, %v208_v28 }
 0x161   :  { %v365_v33 = vpop.f32.mrb[2].mxu0  ;;  %685 = vrot.lane.b32.xlu1 %v2722_v32, %s2612_s0  ;;  %2159 = vmatpush3.xpose.msk.msra.mxu0 %vm520_vm1, %v2722_v32 }
 0x162   :  { %v2730_v35 = vadd.f32 %v365_v33, %v204_v30  ;;  %v367_v36 = vpop.f32.mrb[3].mxu0  ;;  %2163 = vmatprep.subr.mxu0 %v2610_v56  ;;  %v156_v30 = vld [vmem:[#allocation2 + $0x328] sm:$0xff] }
 0x163   :  { %v2733_v37 = vadd.f32 %v367_v36, %v208_v28  ;;  %v102_v28 = vld [vmem:[#allocation2 + $0x178] sm:$0xff]  ;;  %v2401_v33 = vpack.c.bf16 %v156_v30, %v153_v29  ;;  %v159_v36 = vld [vmem:[#allocation2 + $0x340] sm:$0xff] }
 0x164   :  { %2161 = vmatmul.mubr.msk.f32.vlgmr.msra.gmra.mrb[4].mxu0 %vm520_vm1, %v2728_v34  ;;  %v2399_v31 = vpack.c.bf16 %v102_v28, %v99_v27  ;;  %v2405_v39 = vpack.c.bf16 %v162_v38, %v159_v36 }
 0x165   :  { %683 = vrot.lane.b32.xlu1 %v2728_v34, %s2612_s0  ;;  %2165 = vmatprep.mubr.msk.f32.mxu0 %vm2611_vm0, %v2610_v56 }
 0x166   :  { %2400 = vmatpush3.bf16.msra.mxu1 %v2399_v31 }
 0x167   :  { %2402 = vmatprep.subr.bf16.mxu1 %v2401_v33 }
 0x169   :  { %435 = vmatmul.mubr.f32.vlgmr.msra.gmra.mrb[0].mxu1 %v2679_v40  ;;  %v183_v40 = vld [vmem:[#allocation2 + $0x400] sm:$0xff] }
 0x16a   :  { %2404 = vmatpush3.bf16.msra.mxu1 %v2401_v33  ;;  %439 = vmatprep.mubr.f32.mxu1 %v2684_v45  ;;  %v2421_v45 = vpack.c.bf16 %v186_v52, %v183_v40 }
 0x16b   :  { %2406 = vmatprep.subr.bf16.mxu1 %v2405_v39 }
 0x16d   :  { %440 = vmatmul.mubr.f32.gmra.mrb[2].mxu1 %v2691_v49  ;;  %v2425_v49 = vpack.c.bf16 %v192_v54, %v189_v53 }
 0x16e   :  { %2408 = vmatpush3.bf16.msra.mxu1 %v2405_v39  ;;  %2155 = vmatprep.mubr.f32.mxu1 %v2698_v21  ;;  %v2429_v21 = vpack.c.bf16 %v198_v57, %v195_v55 }
 0x16f   :  { %2410 = vmatprep.subr.bf16.mxu1 %v2409_v43 }
 0x172   :  { %2412 = vmatpush3.bf16.msra.mxu1 %v2409_v43 }
 0x173   :  { %2414 = vmatprep.subr.bf16.mxu1 %v2413_v47 }
 0x176   :  { %2416 = vmatpush3.bf16.msra.mxu1 %v2413_v47 }
 0x177   :  { %2418 = vmatprep.subr.bf16.mxu1 %v2417_v51 }
 0x17a   :  { %2420 = vmatpush3.bf16.msra.mxu1 %v2417_v51 }
 0x17b   :  { %2422 = vmatprep.subr.bf16.mxu1 %v2421_v45 }
 0x17e   :  { %2424 = vmatpush3.bf16.msra.mxu1 %v2421_v45 }
 0x17f   :  { %2426 = vmatprep.subr.bf16.mxu1 %v2425_v49 }
 0x182   :  { %2428 = vmatpush3.bf16.msra.mxu1 %v2425_v49 }
 0x183   :  { %2430 = vmatprep.subr.bf16.mxu1 %v2429_v21 }
 0x186   :  { %2432 = vmatpush3.bf16.msra.mxu1 %v2429_v21 }
 0x187   :  { %2173 = vmatprep.subr.mxu1 %v2610_v56 }
 0x189   :  { %2156 = vmatmul.mubr.f32.vlgmr.msra.gmra.mrb[4].mxu1 %v2706_v22  ;;  %v212_v22 = vrot.slane %v2717_v26, %v211_v1 }
 0x18a   :  { %2175 = vmatprep.mubr.msk.f32.mxu1 %vm2611_vm0, %v2610_v56 }
 0x1d3   :  { %v686_v16 = vpop.permute.xlu1 %685 }
 0x1d7   :  { %v684_v18 = vpop.permute.xlu1 %683 }
 0x237   :  { %v593_v58 = vpop.f32.mrb[4].mxu0 }
 0x238   :  { %v597_v59 = vmul.f32 0.17677669, %v593_v58  ;;  %v2162_v60 = vpop.f32.mrb[5].mxu0 }
 0x23a   :  { %v599_v61 = vsel %vm598_vm2, %v597_v59, -inf }
 0x23b   :  { %600 = vmax.xlane.f32.xlu0 %v599_v61 }
 0x23c   :  { %v2049_v62 = vpop.f32.mrb[0].mxu1 }
 0x23d   :  { %v2050_v63 = vpop.f32.mrb[1].mxu1 }
 0x23e   :  { %v2051_v0 = vadd.f32 %v2050_v63, %v2049_v62 }
 0x240   :  { %v2052_v2 = vpop.f32.mrb[2].mxu1  ;;  %v437_v9 = vadd.f32 %v2051_v0, %v212_v22 }
 0x241   :  { %v2053_v3 = vpop.f32.mrb[3].mxu1 }
 0x242   :  { %v2054_v4 = vadd.f32 %v2053_v3, %v2052_v2 }
 0x244   :  { %v442_v5 = vadd.f32 %v2054_v4, %v212_v22 }
 0x25c   :  { %v2157_v10 = vpop.f32.mrb[4].mxu1 }
 0x25d   :  { %v2752_v11 = vadd.f32 %v2157_v10, %v442_v5  ;;  %v511_v12 = vpop.f32.mrb[5].mxu1 }
 0x25e   :  { %v2754_v13 = vadd.f32 %v511_v12, %v437_v9 }
 0x260   :  { %2164 = vmatpush3.msra.mxu0 %v2754_v13 }
 0x261   :  { %2168 = vmatprep.subr.mxu0 %v2610_v56 }
 0x2c8   :  { %v601_v6 = vpop.xlane.xlu0 %600 }
 0x2c9   :  { %v602_v7 = vsub.f32 %v597_v59, %v601_v6 }
 0x2cb   :  { %v603_v8 = vmul.f32 1.442695, %v602_v7 }
 0x2cd   :  { %2500 = vpow2.f32 %v603_v8 }
 0x2d7   :  { %v2501_v24 = vpop.eup %2500 }
 0x2d8   :  { %v605_v14 = vsel %vm598_vm2, %v2501_v24, 0.0 }
 0x2d9   :  { %606 = vadd.xlane.f32.xlu0 %v605_v14 }
 0x366   :  { %v607_v26 = vpop.xlane.xlu0 %606 }
 0x367   :  { %2502 = vrcp.f32 %v607_v26 }
 0x371   :  { %v2503_v15 = vpop.eup %2502 }
 0x372   :  { %v609_v17 = vmul.f32 %v2503_v15, %v2501_v24 }
 0x374   :  { %2166 = vmatmul.mubr.msk.f32.vlgmr.msra.gmra.mrb[6].mxu0 %vm598_vm2, %v609_v17 }
 0x375   :  { %2169 = vmatpush3.xpose.msk.msra.mxu0 %vm520_vm1, %v686_v16  ;;  %2170 = vmatprep.mubr.msk.f32.mxu0 %vm2611_vm0, %v2610_v56 }
 0x376   :  { %2203 = vmatprep.subr.mxu0 %v2610_v56 }
 0x378   :  { %2171 = vmatmul.mubr.msk.f32.vlgmr.msra.gmra.mrb[8].mxu0 %vm520_vm1, %v684_v18 }
 0x379   :  { %2204 = vmatpush3.msra.mxu0 %v2752_v11  ;;  %2205 = vmatprep.mubr.msk.f32.mxu0 %vm2611_vm0, %v2610_v56 }
 0x37a   :  { %2213 = vmatprep.subr.mxu0 %v2610_v56 }
 0x447   :  { %v2769_v19 = vpop.f32.mrb[6].mxu0 }
 0x448   :  { %v2167_v20 = vpop.f32.mrb[7].mxu0 }
 0x44b   :  { %v757_v23 = vpop.f32.mrb[8].mxu0 }
 0x44c   :  { %v761_v25 = vmul.f32 0.17677669, %v757_v23  ;;  %v2172_v27 = vpop.f32.mrb[9].mxu0 }
 0x44e   :  { %v762_v28 = vsel %vm598_vm2, %v761_v25, -inf }
 0x44f   :  { %763 = vmax.xlane.f32.xlu0 %v762_v28 }
 0x465   :  { %774 = vrot.lane.b32.xlu0 %v2754_v13, %s2612_s0 }
 0x469   :  { %852 = vrot.lane.b32.xlu0 %v2722_v32, %s2613_s2 }
 0x46d   :  { %850 = vrot.lane.b32.xlu0 %v2728_v34, %s2613_s2 }
 0x4dc   :  { %v764_v29 = vpop.xlane.xlu0 %763 }
 0x4dd   :  { %v765_v30 = vsub.f32 %v761_v25, %v764_v29 }
 0x4df   :  { %v766_v31 = vmul.f32 1.442695, %v765_v30 }
 0x4e0   :  { %v775_v33 = vpop.permute.xlu0 %774 }
 0x4e1   :  { %2504 = vpow2.f32 %v766_v31  ;;  %2174 = vmatpush3.msra.mxu1 %v775_v33 }
 0x4e2   :  { %2178 = vmatprep.subr.mxu1 %v2610_v56 }
 0x4e4   :  { %v853_v42 = vpop.permute.xlu0 %852 }
 0x4e8   :  { %v851_v44 = vpop.permute.xlu0 %850 }
 0x4eb   :  { %v2505_v36 = vpop.eup %2504 }
 0x4ec   :  { %v768_v38 = vsel %vm598_vm2, %v2505_v36, 0.0 }
 0x4ed   :  { %769 = vadd.xlane.f32.xlu1 %v768_v38 }
 0x4fe   :  { %940 = vrot.lane.b32.xlu1 %v2754_v13, %s2613_s2 }
 0x502   :  { %1018 = vrot.lane.b32.xlu1 %v2722_v32, %s2614_s8 }
 0x57a   :  { %v770_v39 = vpop.xlane.xlu1 %769 }
 0x57b   :  { %2506 = vrcp.f32 %v770_v39 }
 0x57e   :  { %v941_v46 = vpop.permute.xlu1 %940 }
 0x582   :  { %v1019_v55 = vpop.permute.xlu1 %1018 }
 0x585   :  { %v2507_v41 = vpop.eup %2506 }
 0x586   :  { %v772_v43 = vmul.f32 %v2507_v41, %v2505_v36 }
 0x588   :  { %2176 = vmatmul.mubr.msk.f32.vlgmr.msra.gmra.mrb[6].mxu1 %vm598_vm2, %v772_v43 }
 0x589   :  { %2179 = vmatpush3.xpose.msk.msra.mxu1 %vm520_vm1, %v853_v42  ;;  %2180 = vmatprep.mubr.msk.f32.mxu1 %vm2611_vm0, %v2610_v56 }
 0x58a   :  { %2183 = vmatprep.subr.mxu1 %v2610_v56 }
 0x58c   :  { %2181 = vmatmul.mubr.msk.f32.vlgmr.msra.gmra.mrb[8].mxu1 %vm520_vm1, %v851_v44 }
 0x58d   :  { %2184 = vmatpush3.msra.mxu1 %v941_v46  ;;  %2185 = vmatprep.mubr.msk.f32.mxu1 %vm2611_vm0, %v2610_v56 }
 0x58e   :  { %2188 = vmatprep.subr.mxu1 %v2610_v56 }
 0x65b   :  { %v2793_v32 = vpop.f32.mrb[6].mxu1 }
 0x65c   :  { %v2177_v47 = vpop.f32.mrb[7].mxu1 }
 0x65f   :  { %v924_v48 = vpop.f32.mrb[8].mxu1 }
 0x660   :  { %v928_v50 = vmul.f32 0.17677669, %v924_v48  ;;  %v2182_v51 = vpop.f32.mrb[9].mxu1 }
 0x662   :  { %v929_v40 = vsel %vm598_vm2, %v928_v50, -inf }
 0x663   :  { %930 = vmax.xlane.f32.xlu0 %v929_v40 }
 0x6f0   :  { %v931_v52 = vpop.xlane.xlu0 %930 }
 0x6f1   :  { %v932_v45 = vsub.f32 %v928_v50, %v931_v52 }
 0x6f3   :  { %v933_v53 = vmul.f32 1.442695, %v932_v45 }
 0x6f5   :  { %2508 = vpow2.f32 %v933_v53 }
 0x6ff   :  { %v2509_v54 = vpop.eup %2508 }
 0x700   :  { %v935_v49 = vsel %vm598_vm2, %v2509_v54, 0.0 }
 0x701   :  { %936 = vadd.xlane.f32.xlu1 %v935_v49 }
 0x712   :  { %1016 = vrot.lane.b32.xlu1 %v2728_v34, %s2614_s8 }
 0x78e   :  { %v937_v57 = vpop.xlane.xlu1 %936 }
 0x78f   :  { %2510 = vrcp.f32 %v937_v57 }
 0x792   :  { %v1017_v59 = vpop.permute.xlu1 %1016 }
 0x799   :  { %v2511_v21 = vpop.eup %2510 }
 0x79a   :  { %v939_v58 = vmul.f32 %v2511_v21, %v2509_v54 }
 0x79c   :  { %2186 = vmatmul.mubr.msk.f32.vlgmr.msra.gmra.mrb[10].mxu1 %vm598_vm2, %v939_v58 }
 0x79d   :  { %2189 = vmatpush3.xpose.msk.msra.mxu1 %vm520_vm1, %v1019_v55  ;;  %2190 = vmatprep.mubr.msk.f32.mxu1 %vm2611_vm0, %v2610_v56 }
 0x79e   :  { %2193 = vmatprep.subr.mxu1 %v2610_v56 }
 0x7a0   :  { %2191 = vmatmul.mubr.msk.f32.vlgmr.msra.gmra.mrb[12].mxu1 %vm520_vm1, %v1017_v59 }
 0x7a1   :  { %2195 = vmatprep.mubr.msk.f32.mxu1 %vm2611_vm0, %v2610_v56 }
 0x86f   :  { %v2807_v34 = vpop.f32.mrb[10].mxu1 }
 0x870   :  { %v2187_v60 = vpop.f32.mrb[11].mxu1 }
 0x873   :  { %v1090_v61 = vpop.f32.mrb[12].mxu1 }
 0x874   :  { %v1094_v62 = vmul.f32 0.17677669, %v1090_v61  ;;  %v2192_v63 = vpop.f32.mrb[13].mxu1 }
 0x876   :  { %v1095_v0 = vsel %vm598_vm2, %v1094_v62, -inf }
 0x877   :  { %1096 = vmax.xlane.f32.xlu0 %v1095_v0 }
 0x88d   :  { %1106 = vrot.lane.b32.xlu0 %v2754_v13, %s2614_s8 }
 0x891   :  { %1362 = vrot.lane.b32.xlu0 %v2733_v37, %s2612_s0 }
 0x895   :  { %1360 = vrot.lane.b32.xlu0 %v2730_v35, %s2612_s0 }
 0x899   :  { %1529 = vrot.lane.b32.xlu0 %v2733_v37, %s2613_s2 }
 0x89d   :  { %1695 = vrot.lane.b32.xlu0 %v2733_v37, %s2614_s8 }
 0x8a1   :  { %1693 = vrot.lane.b32.xlu0 %v2730_v35, %s2614_s8 }
 0x904   :  { %v1097_v1 = vpop.xlane.xlu0 %1096 }
 0x905   :  { %v1098_v2 = vsub.f32 %v1094_v62, %v1097_v1 }
 0x907   :  { %v1099_v3 = vmul.f32 1.442695, %v1098_v2 }
 0x908   :  { %v1107_v4 = vpop.permute.xlu0 %1106 }
 0x909   :  { %2512 = vpow2.f32 %v1099_v3  ;;  %2194 = vmatpush3.msra.mxu1 %v1107_v4 }
 0x90a   :  { %2198 = vmatprep.subr.mxu1 %v2610_v56 }
 0x90c   :  { %v1363_v7 = vpop.permute.xlu0 %1362 }
 0x910   :  { %v1361_v9 = vpop.permute.xlu0 %1360 }
 0x913   :  { %v2513_v22 = vpop.eup %2512 }
 0x914   :  { %v1101_v5 = vsel %vm598_vm2, %v2513_v22, 0.0  ;;  %v1530_v12 = vpop.permute.xlu0 %1529 }
 0x915   :  { %1102 = vadd.xlane.f32.xlu1 %v1101_v5 }
 0x918   :  { %v1696_v13 = vpop.permute.xlu0 %1695 }
 0x926   :  { %1527 = vrot.lane.b32.xlu1 %v2730_v35, %s2613_s2 }
 0x9a2   :  { %v1103_v6 = vpop.xlane.xlu1 %1102 }
 0x9a3   :  { %2514 = vrcp.f32 %v1103_v6 }
 0x9ad   :  { %v2515_v8 = vpop.eup %2514 }
 0x9ae   :  { %v1105_v10 = vmul.f32 %v2515_v8, %v2513_v22  ;;  %v1874_v8 = vld [vmem:[#allocation5] sm:$0xff] }
 0x9b0   :  { %2196 = vmatmul.mubr.msk.f32.vlgmr.msra.gmra.mrb[14].mxu1 %vm598_vm2, %v1105_v10  ;;  %v1876_v10 = vld [vmem:[#allocation5 + $0x10] sm:$0xff] }
 0x9b1   :  { %2199 = vmatpush3.xpose.msk.msra.mxu1 %vm520_vm1, %v2733_v37  ;;  %2200 = vmatprep.mubr.msk.f32.mxu1 %vm2611_vm0, %v2610_v56  ;;  %v1528_v37 = vpop.permute.xlu1 %1527 }
 0x9b2   :  { %2208 = vmatprep.subr.mxu1 %v2610_v56 }
 0x9b4   :  { %2201 = vmatmul.mubr.msk.f32.vlgmr.msra.gmra.mrb[16].mxu1 %vm520_vm1, %v2730_v35  ;;  %v1694_v35 = vpop.permute.xlu0 %1693 }
 0x9b5   :  { %2209 = vmatpush3.xpose.msk.msra.mxu1 %vm520_vm1, %v1363_v7  ;;  %2210 = vmatprep.mubr.msk.f32.mxu1 %vm2611_vm0, %v2610_v56 }
 0x9b6   :  { %2218 = vmatprep.subr.mxu1 %v2610_v56 }
 0x9b8   :  { %2211 = vmatmul.mubr.msk.f32.vlgmr.msra.gmra.mrb[18].mxu1 %vm520_vm1, %v1361_v9  ;;  %v1875_v9 = vld [vmem:[#allocation5 + $0x8] sm:$0xff] }
 0x9b9   :  { %2219 = vmatpush3.xpose.msk.msra.mxu1 %vm520_vm1, %v1530_v12  ;;  %2220 = vmatprep.mubr.msk.f32.mxu1 %vm2611_vm0, %v2610_v56  ;;  %v2433_v12 = vpack.c.bf16 %v1875_v9, %v1874_v8 }
 0x9ba   :  { %2228 = vmatprep.subr.mxu1 %v2610_v56 }
 0x9bc   :  { %2221 = vmatmul.mubr.msk.f32.vlgmr.msra.gmra.mrb[20].mxu1 %vm520_vm1, %v1528_v37 }
 0x9bd   :  { %2229 = vmatpush3.xpose.msk.msra.mxu1 %vm520_vm1, %v1696_v13  ;;  %2230 = vmatprep.mubr.msk.f32.mxu1 %vm2611_vm0, %v2610_v56  ;;  %v1877_v13 = vld [vmem:[#allocation5 + $0x18] sm:$0xff] }
 0x9be   :  { %v2437_v37 = vpack.c.bf16 %v1877_v13, %v1876_v10  ;;  %2434 = vmatprep.subr.bf16.mxu1 %v2433_v12 }
 0x9c0   :  { %2231 = vmatmul.mubr.msk.f32.vlgmr.msra.gmra.mrb[22].mxu1 %vm520_vm1, %v1694_v35  ;;  %v1878_v35 = vld [vmem:[#allocation5 + $0x20] sm:$0xff] }
 0x9c1   :  { %2436 = vmatpush3.bf16.msra.mxu1 %v2433_v12 }
 0x9c2   :  { %2438 = vmatprep.subr.bf16.mxu1 %v2437_v37 }
 0x9c5   :  { %2440 = vmatpush3.bf16.msra.mxu1 %v2437_v37 }
 0xa83   :  { %v2848_v24 = vpop.f32.mrb[14].mxu1 }
 0xa84   :  { %v2197_v14 = vpop.f32.mrb[15].mxu1 }
 0xa85   :  { %v1879_v14 = vld [vmem:[#allocation5 + $0x28] sm:$0xff] }
 0xa87   :  { %v1271_v26 = vpop.f32.mrb[16].mxu1 }
 0xa88   :  { %v1275_v15 = vmul.f32 0.17677669, %v1271_v26  ;;  %v2202_v16 = vpop.f32.mrb[17].mxu1  ;;  %v2441_v26 = vpack.c.bf16 %v1879_v14, %v1878_v35 }
 0xa89   :  { %v1881_v16 = vld [vmem:[#allocation5 + $0x38] sm:$0xff] }
 0xa8a   :  { %v1276_v17 = vsel %vm598_vm2, %v1275_v15, -inf  ;;  %2442 = vmatprep.subr.bf16.mxu1 %v2441_v26 }
 0xa8b   :  { %1277 = vmax.xlane.f32.xlu0 %v1276_v17  ;;  %v1434_v18 = vpop.f32.mrb[18].mxu1  ;;  %v1882_v17 = vld [vmem:[#allocation5 + $0x40] sm:$0xff]  ;;  %2444 = vmatpush3.bf16.msra.mxu1 %v2441_v26 }
 0xa8c   :  { %v1438_v20 = vmul.f32 0.17677669, %v1434_v18  ;;  %v2212_v23 = vpop.f32.mrb[19].mxu1  ;;  %v1883_v18 = vld [vmem:[#allocation5 + $0x48] sm:$0xff] }
 0xa8d   :  { %v1884_v23 = vld [vmem:[#allocation5 + $0x50] sm:$0xff] }
 0xa8e   :  { %v1439_v25 = vsel %vm598_vm2, %v1438_v20, -inf }
 0xa8f   :  { %1440 = vmax.xlane.f32.xlu1 %v1439_v25  ;;  %v1601_v27 = vpop.f32.mrb[20].mxu1  ;;  %v1885_v25 = vld [vmem:[#allocation5 + $0x58] sm:$0xff] }
 0xa90   :  { %v1605_v28 = vmul.f32 0.17677669, %v1601_v27  ;;  %v2222_v29 = vpop.f32.mrb[21].mxu1  ;;  %v2453_v27 = vpack.c.bf16 %v1885_v25, %v1884_v23 }
 0xa91   :  { %v1887_v29 = vld [vmem:[#allocation5 + $0x68] sm:$0xff] }
 0xa92   :  { %v1606_v30 = vsel %vm598_vm2, %v1605_v28, -inf }
 0xa93   :  { %1607 = vmax.xlane.f32.xlu0 %v1606_v30  ;;  %v1767_v31 = vpop.f32.mrb[22].mxu1 }
 0xa94   :  { %v1771_v33 = vmul.f32 0.17677669, %v1767_v31  ;;  %v2232_v36 = vpop.f32.mrb[23].mxu1 }
 0xa95   :  { %v1889_v36 = vld [vmem:[#allocation5 + $0x78] sm:$0xff] }
 0xa96   :  { %v1772_v38 = vsel %vm598_vm2, %v1771_v33, -inf }
 0xa97   :  { %1773 = vmax.xlane.f32.xlu0 %v1772_v38 }
 0xaa0   :  { %1451 = vrot.lane.b32.xlu1 %v2752_v11, %s2612_s0 }
 0xb18   :  { %v1278_v39 = vpop.xlane.xlu0 %1277 }
 0xb19   :  { %v1279_v41 = vsub.f32 %v1275_v15, %v1278_v39  ;;  %v1880_v15 = vld [vmem:[#allocation5 + $0x30] sm:$0xff] }
 0xb1b   :  { %v1280_v42 = vmul.f32 1.442695, %v1279_v41 }
 0xb1c   :  { %v1441_v43 = vpop.xlane.xlu1 %1440 }
 0xb1d   :  { %2516 = vpow2.f32 %v1280_v42  ;;  %v1442_v44 = vsub.f32 %v1438_v20, %v1441_v43  ;;  %v2449_v20 = vpack.c.bf16 %v1883_v18, %v1882_v17 }
 0xb1f   :  { %v1443_v46 = vmul.f32 1.442695, %v1442_v44 }
 0xb20   :  { %v1608_v47 = vpop.xlane.xlu0 %1607  ;;  %v1452_v60 = vpop.permute.xlu1 %1451 }
 0xb21   :  { %2518 = vpow2.f32 %v1443_v46  ;;  %v1609_v48 = vsub.f32 %v1605_v28, %v1608_v47  ;;  %v1886_v28 = vld [vmem:[#allocation5 + $0x60] sm:$0xff] }
 0xb22   :  { %v2457_v30 = vpack.c.bf16 %v1887_v29, %v1886_v28 }
 0xb23   :  { %v1610_v50 = vmul.f32 1.442695, %v1609_v48 }
 0xb24   :  { %v1774_v51 = vpop.xlane.xlu0 %1773 }
 0xb25   :  { %2520 = vpow2.f32 %v1610_v50  ;;  %v1775_v40 = vsub.f32 %v1771_v33, %v1774_v51  ;;  %v1888_v33 = vld [vmem:[#allocation5 + $0x70] sm:$0xff] }
 0xb26   :  { %v2461_v39 = vpack.c.bf16 %v1889_v36, %v1888_v33 }
 0xb27   :  { %v2517_v52 = vpop.eup %2516  ;;  %v1776_v45 = vmul.f32 1.442695, %v1775_v40 }
 0xb28   :  { %v1282_v53 = vsel %vm598_vm2, %v2517_v52, 0.0 }
 0xb29   :  { %2522 = vpow2.f32 %v1776_v45  ;;  %1283 = vadd.xlane.f32.xlu0 %v1282_v53 }
 0xb2b   :  { %v2519_v54 = vpop.eup %2518 }
 0xb2c   :  { %v1445_v49 = vsel %vm598_vm2, %v2519_v54, 0.0 }
 0xb2d   :  { %1446 = vadd.xlane.f32.xlu0 %v1445_v49 }
 0xb2f   :  { %v2521_v55 = vpop.eup %2520 }
 0xb30   :  { %v1612_v57 = vsel %vm598_vm2, %v2521_v55, 0.0 }
 0xb31   :  { %1613 = vadd.xlane.f32.xlu1 %v1612_v57 }
 0xb33   :  { %v2523_v21 = vpop.eup %2522 }
 0xb34   :  { %v1778_v58 = vsel %vm598_vm2, %v2523_v21, 0.0 }
 0xb35   :  { %1779 = vadd.xlane.f32.xlu0 %v1778_v58 }
 0xb42   :  { %1783 = vrot.lane.b32.xlu1 %v2752_v11, %s2614_s8 }
 0xb4b   :  { %1617 = vrot.lane.b32.xlu0 %v2752_v11, %s2613_s2 }
 0xbb6   :  { %v1284_v59 = vpop.xlane.xlu0 %1283 }
 0xbb7   :  { %2524 = vrcp.f32 %v1284_v59 }
 0xbba   :  { %v1447_v61 = vpop.xlane.xlu0 %1446 }
 0xbbb   :  { %2526 = vrcp.f32 %v1447_v61  ;;  %v2016_v61 = vld [vmem:[%s2907_s4] ss:$0 sm:$0xff] }
 0xbbe   :  { %v1614_v62 = vpop.xlane.xlu1 %1613 }
 0xbbf   :  { %2528 = vrcp.f32 %v1614_v62 }
 0xbc1   :  { %v2525_v63 = vpop.eup %2524 }
 0xbc2   :  { %v1286_v0 = vmul.f32 %v2525_v63, %v2517_v52  ;;  %v1780_v1 = vpop.xlane.xlu0 %1779  ;;  %v1784_v5 = vpop.permute.xlu1 %1783 }
 0xbc3   :  { %2530 = vrcp.f32 %v1780_v1 }
 0xbc4   :  { %2206 = vmatmul.mubr.msk.f32.vlgmr.msra.gmra.mrb[10].mxu0 %vm598_vm2, %v1286_v0 }
 0xbc5   :  { %v2527_v2 = vpop.eup %2526  ;;  %2214 = vmatpush3.msra.mxu0 %v1452_v60  ;;  %2215 = vmatprep.mubr.msk.f32.mxu0 %vm2611_vm0, %v2610_v56 }
 0xbc6   :  { %v1449_v3 = vmul.f32 %v2527_v2, %v2519_v54  ;;  %v1618_v11 = vpop.permute.xlu0 %1617  ;;  %2223 = vmatprep.subr.mxu0 %v2610_v56 }
 0xbc8   :  { %2216 = vmatmul.mubr.msk.f32.vlgmr.msra.gmra.mrb[12].mxu0 %vm598_vm2, %v1449_v3 }
 0xbc9   :  { %v2529_v4 = vpop.eup %2528  ;;  %2224 = vmatpush3.msra.mxu0 %v1618_v11  ;;  %2225 = vmatprep.mubr.msk.f32.mxu0 %vm2611_vm0, %v2610_v56 }
 0xbca   :  { %v1616_v22 = vmul.f32 %v2529_v4, %v2521_v55  ;;  %2233 = vmatprep.subr.mxu0 %v2610_v56 }
 0xbcc   :  { %2226 = vmatmul.mubr.msk.f32.vlgmr.msra.gmra.mrb[14].mxu0 %vm598_vm2, %v1616_v22 }
 0xbcd   :  { %v2531_v6 = vpop.eup %2530  ;;  %2234 = vmatpush3.msra.mxu0 %v1784_v5  ;;  %2235 = vmatprep.mubr.msk.f32.mxu0 %vm2611_vm0, %v2610_v56  ;;  %v2445_v56 = vpack.c.bf16 %v1881_v16, %v1880_v15 }
 0xbce   :  { %v1782_v7 = vmul.f32 %v2531_v6, %v2523_v21 }
 0xbcf   :  { %2446 = vmatprep.subr.bf16.mxu1 %v2445_v56 }
 0xbd0   :  { %2236 = vmatmul.mubr.msk.f32.vlgmr.msra.gmra.mrb[16].mxu0 %vm598_vm2, %v1782_v7  ;;  %2448 = vmatpush3.bf16.msra.mxu1 %v2445_v56 }
 0xbd1   :  { %2450 = vmatprep.subr.bf16.mxu1 %v2449_v20 }
 0xbd4   :  { %2452 = vmatpush3.bf16.msra.mxu1 %v2449_v20 }
 0xbd5   :  { %2454 = vmatprep.subr.bf16.mxu1 %v2453_v27 }
 0xbd8   :  { %2456 = vmatpush3.bf16.msra.mxu1 %v2453_v27 }
 0xbd9   :  { %2458 = vmatprep.subr.bf16.mxu1 %v2457_v30 }
 0xbdc   :  { %2460 = vmatpush3.bf16.msra.mxu1 %v2457_v30 }
 0xbdd   :  { %2462 = vmatprep.subr.bf16.mxu1 %v2461_v39 }
 0xbe0   :  { %2464 = vmatpush3.bf16.msra.mxu1 %v2461_v39 }
 0xc97   :  { %v1356_v31 = vpop.f32.mrb[10].mxu0 }
 0xc98   :  { %v2207_v38 = vpop.f32.mrb[11].mxu0 }
 0xc9b   :  { %v1523_v41 = vpop.f32.mrb[12].mxu0 }
 0xc9c   :  { %v2485_v42 = vpack.i.bf16 %v1523_v41, %v2793_v32  ;;  %v2217_v43 = vpop.f32.mrb[13].mxu0 }
 0xc9e   :  { %2486 = vrot.lane.b32.xlu1 %v2485_v42, %s2614_s8 }
 0xc9f   :  { %v1689_v44 = vpop.f32.mrb[14].mxu0 }
 0xca0   :  { %v2490_v46 = vpack.i.bf16 %v1689_v44, %v2807_v34  ;;  %v2227_v47 = vpop.f32.mrb[15].mxu0 }
 0xca2   :  { %2491 = vrot.lane.b32.xlu1 %v2490_v46, %s2613_s2 }
 0xca3   :  { %v1855_v48 = vpop.f32.mrb[16].mxu0 }
 0xca4   :  { %v2495_v50 = vpack.i.bf16 %v1855_v48, %v2848_v24  ;;  %v2237_v51 = vpop.f32.mrb[17].mxu0 }
 0xca6   :  { %2496 = vrot.lane.b32.xlu0 %v2495_v50, %s2612_s0 }
 0xd10   :  { %v2487_v40 = vpop.permute.xlu1 %2486 }
 0xd11   :  { %v2489_v45 = vunpack.i.h.bf16 %v2487_v40  ;;  %v2488_v53 = vunpack.i.l.bf16 %v2487_v40 }
 0xd13   :  { %v1871_v34 = vsel %vm520_vm1, %v1356_v31, %v2489_v45  ;;  %v1194_v21 = vsel %vm520_vm1, %v2769_v19, %v2488_v53 }
 0xd14   :  { %v2492_v52 = vpop.permute.xlu1 %2491 }
 0xd15   :  { %v2494_v32 = vunpack.i.h.bf16 %v2492_v52  ;;  %v2493_v54 = vunpack.i.l.bf16 %v2492_v52 }
 0xd17   :  { %v1872_v24 = vsel %vm1195_vm3, %v1871_v34, %v2494_v32  ;;  %v1196_v58 = vsel %vm1195_vm3, %v1194_v21, %v2493_v54 }
 0xd18   :  { %v2497_v49 = vpop.permute.xlu0 %2496 }
 0xd19   :  { %v2499_v55 = vunpack.i.h.bf16 %v2497_v49  ;;  %v2498_v57 = vunpack.i.l.bf16 %v2497_v49 }
 0xd1b   :  { %v1198_v59 = vsel %vm1197_vm4, %v1196_v58, %v2498_v57  ;;  %v1873_v60 = vsel %vm1197_vm4, %v1872_v24, %v2499_v55 }
 0xd1c   :  { %2270 = vmatprep.mubr.f32.mxu1 %v1198_v59 }
 0xd1d   :  { %2271 = vmatmul.mubr.f32.vlgmr.msra.gmra.mrb[24].mxu1 %v1873_v60 }
 0xdf0   :  { %v2272_v62 = vpop.f32.mrb[24].mxu1 }
 0xdf1   :  { %v1969_v63 = vadd.f32 %v2272_v62, %v2016_v61  ;;  %v1963_v0 = vpop.f32.mrb[25].mxu1 }
 0xdf2   :  { %v1964_v1 = vadd.f32 %v2016_v61, %v1963_v0 }
 0xdf3   :  { %1973 = vst [vmem:[#allocation7 + $0x8] sm:$0xff] %v1969_v63 }
 0xdf4   :  { %1972 = vst [vmem:[#allocation7] sm:$0xff] %v1964_v1 }
 0xdf5   :  { %2587 = shalt.err (!%p2584_p6)
}
 0xdf6   :  { %s2588_s4 = scalar_lea.hbm %s2908_s5, 256 }
 0xdf7   :  { %p2589_p7 = scmp.ne.s32.totalorder %s2908_s5, %s2588_s4  ;;  %p2592_p8 = scmp.lt.u32.totalorder %s2588_s4, %s2908_s5 }
 0xdf9   :  { %p2594_p9 = pnand %p2592_p8, %p2589_p7 }
 0xdfb   :  { %2597 = shalt.err (!%p2594_p9)
}
 0xdfc   :  { %1985 = dma.vmem_to_hbm [thread:$0]  %s1980_s12, 256, %s2908_s5, [#allocation4], %s2608_s1, %s2608_s1, %s2609_s17  }
 0xdfd   :  { %2602 = dma.done.wait [#allocation4], 256  }
 0xdfe   :  { %2603 = vsyncadd [#allocation4], 4294967040 }
 0xdff   :  { %1989 = vsyncpa [#allocation3], 1 }
 0xe00   :  { %1990 = vsyncpa [#allocation6], 1 }
 0xe01   :  { %1991 = vsyncpa [#allocation4], 1 }

</bundles_post_ra>
